<compile_context>
chip_gen: v6e
topology: v6e:2x2x1
jax: 0.10.0
libtpu: 0.0.40
codegen_flags: <defaults>
</compile_context>

<pallas_src>
import jax
import jax.numpy as jnp
from jax.experimental import pallas as pl
from jax.experimental.pallas import tpu as pltpu

# Small model hyper-params consistent with the PyTorch module's __init__.
VOCAB = 16
EMBED = 32
HIDDEN = 32
NUM_LAYERS = 2
BATCH = 2
SEQ = 8

B_PAD = 8      # pad batch to a full f32 sublane tile
V_PAD = 128    # pad vocab (one-hot K dim and logits lanes) to a full lane tile


# ---------------------------------------------------------------------------
# Fused Pallas kernel
# ---------------------------------------------------------------------------
def _fused_forward_kernel(tok_ref, emb_tab_ref, w_rec_ref, bias_ref,
                          w_lin_ref, b_lin_ref, state0_ref,
                          logits_ref, stateT_ref):
    """Embedding + L-layer LSTM (wavefronted) + padded linear in one kernel.

    Inputs (time-major rows, batch padded to B_PAD):
      tok:     (T*B_PAD, 1) int32 token ids
      emb_tab: (V_PAD, 4H)   = embed @ w_ih[0], vocab rows zero-padded
      w_rec:   (L*H, L*4H)   block staircase: [l,l]=w_hh[l], [l,l+1]=w_ih[l+1]
      bias:    (1, L*4H)     per-layer combined biases, gate order (i,f,o,g)
      w_lin:   (H, V_PAD), b_lin: (1, V_PAD)   lane-padded output projection
      state0:  (2L, B_PAD, H)  rows 0..L-1 = h0 per layer, L..2L-1 = c0
    Outputs:
      logits:  (T*B_PAD, V_PAD)   time-major rows (row = t*B_PAD + b)
      stateT:  (2L, B_PAD, H)     final h (0..L-1) and c (L..2L-1)
    """
    b_pad = state0_ref.shape[1]
    H = state0_ref.shape[2]
    L = state0_ref.shape[0] // 2
    G = 4 * H
    TB = tok_ref.shape[0]
    T = TB // b_pad
    Vp = emb_tab_ref.shape[0]

    # ---- Hoisted phase (off the recurrence critical path) -----------------
    # Embedding folded into layer-0's input projection: one full-vreg compare
    # and one aligned K=128 MXU push produce pre-gates for all T*B rows.
    tok = tok_ref[...]                                            # (TB, 1)
    iota = jax.lax.broadcasted_iota(jnp.int32, (TB, Vp), 1)
    one_hot = (iota == tok).astype(jnp.float32)                   # (TB, 128)
    pre0 = jnp.dot(one_hot, emb_tab_ref[...],
                   preferred_element_type=jnp.float32)            # (TB, 4H)

    w_rec = w_rec_ref[...]                                        # (L*H, L*4H)
    # Hoist the bias broadcast out of the wave loop (no CSE of broadcasts).
    bias_full = jnp.broadcast_to(bias_ref[...], (b_pad, L * G))

    h = [state0_ref[l] for l in range(L)]                         # (B_PAD, H)
    c = [state0_ref[L + l] for l in range(L)]

    def lstm_cell(gates, c_prev):
        # Gate order (i, f, o, g): one 96-lane sigmoid + one 32-lane tanh.
        sig = jax.nn.sigmoid(gates[:, :3 * H])
        i_g = sig[:, 0 * H:1 * H]
        f_g = sig[:, 1 * H:2 * H]
        o_g = sig[:, 2 * H:3 * H]
        g_g = jnp.tanh(gates[:, 3 * H:])
        c_new = f_g * c_prev + i_g * g_g
        h_new = o_g * jnp.tanh(c_new)
        return h_new, c_new

    outs = []
    # ---- Wavefront recurrence: wave step s runs layer l at time t = s - l --
    # Every active layer's gates at this wave step are functions of the h/c
    # state from wave step s-1 only, so a single block-staircase matmul per
    # step feeds all layers (own recurrence + input from the layer below).
    for s in range(T + L - 1):            # static -> fully unrolled
        hcat = jnp.concatenate(h, axis=1) if L > 1 else h[0]      # (B_PAD, L*H)
        rec = jnp.dot(hcat, w_rec,
                      preferred_element_type=jnp.float32) + bias_full
        for l in range(L):
            t = s - l
            if 0 <= t < T:                # static Python condition
                g = rec[:, l * G:(l + 1) * G]
                if l == 0:
                    g = g + pre0[t * b_pad:(t + 1) * b_pad, :]
                h[l], c[l] = lstm_cell(g, c[l])
                if l == L - 1:
                    outs.append(h[l])

    # Final projection on the lane-padded slab -> (TB, 128) unmasked stores.
    out = jnp.concatenate(outs, axis=0)                           # (TB, H)
    logits_ref[...] = (jnp.dot(out, w_lin_ref[...],
                               preferred_element_type=jnp.float32)
                       + b_lin_ref[...])
    for l in range(L):
        stateT_ref[l] = h[l]
        stateT_ref[L + l] = c[l]


def _fused_forward(tok_pad, params, state0):
    TB = tok_pad.shape[0]
    L2, b_pad, H = state0.shape
    vmem = pl.BlockSpec(memory_space=pltpu.MemorySpace.VMEM)

    args = [tok_pad, params["emb_tab"], params["w_rec"], params["bias_row"],
            params["w_lin_pad"], params["b_lin_pad"], state0]
    out_shapes = (
        jax.ShapeDtypeStruct((TB, V_PAD), jnp.float32),           # logits (padded)
        jax.ShapeDtypeStruct((L2, b_pad, H), jnp.float32),        # packed h_T / c_T
    )
    # Single launch, whole problem (~70 KB) resident in VMEM; no grid.  Do NOT
    # split across TensorCores at this size (per perf review).
    return pl.pallas_call(
        _fused_forward_kernel,
        out_shape=out_shapes,
        in_specs=[vmem] * len(args),
        out_specs=(vmem, vmem),
    )(*args)


# ---------------------------------------------------------------------------
# Model: parameter init + forward (matches TextGenerator.forward semantics)
# ---------------------------------------------------------------------------
def init_params(key):
    """Raw per-layer weights (for the reference) plus the fused kernel slabs.
    Gate order along each 4H block is (i, f, o, g)."""
    H, G, L = HIDDEN, 4 * HIDDEN, NUM_LAYERS
    k = 1.0 / jnp.sqrt(jnp.float32(H))
    keys = jax.random.split(key, 3 + 4 * L)
    params = {"w_ih": [], "w_hh": [], "b": []}
    params["embed"] = jax.random.normal(keys[0], (VOCAB, EMBED), jnp.float32)
    ki = 1
    for layer in range(L):
        d_in = EMBED if layer == 0 else H
        w_ih = jax.random.uniform(keys[ki], (d_in, G), jnp.float32, -k, k); ki += 1
        w_hh = jax.random.uniform(keys[ki], (H, G), jnp.float32, -k, k); ki += 1
        b_ih = jax.random.uniform(keys[ki], (1, G), jnp.float32, -k, k); ki += 1
        b_hh = jax.random.uniform(keys[ki], (1, G), jnp.float32, -k, k); ki += 1
        params["w_ih"].append(w_ih)
        params["w_hh"].append(w_hh)
        params["b"].append(b_ih + b_hh)
    w_lin = jax.random.uniform(keys[ki], (H, VOCAB), jnp.float32, -k, k); ki += 1
    b_lin = jax.random.uniform(keys[ki], (1, VOCAB), jnp.float32, -k, k)
    params["w_lin"] = w_lin
    params["b_lin"] = b_lin

    # ---- Fused slabs for the kernel (built once, outside the hot path) ----
    # Embedding folded into layer-0's input projection, vocab padded to 128.
    emb_tab = jnp.zeros((V_PAD, G), jnp.float32)
    emb_tab = emb_tab.at[:VOCAB].set(
        jnp.dot(params["embed"], params["w_ih"][0],
                precision=jax.lax.Precision.HIGHEST))
    params["emb_tab"] = emb_tab

    # Block-staircase recurrence matrix: row-block l -> [w_hh[l] | w_ih[l+1]].
    w_rec = jnp.zeros((L * H, L * G), jnp.float32)
    for l in range(L):
        w_rec = w_rec.at[l * H:(l + 1) * H, l * G:(l + 1) * G].set(
            params["w_hh"][l])
        if l + 1 < L:
            w_rec = w_rec.at[l * H:(l + 1) * H, (l + 1) * G:(l + 2) * G].set(
                params["w_ih"][l + 1])
    params["w_rec"] = w_rec
    params["bias_row"] = jnp.concatenate(params["b"], axis=1)     # (1, L*G)

    # Lane-dense (128-column) output projection.
    params["w_lin_pad"] = jnp.pad(w_lin, ((0, 0), (0, V_PAD - VOCAB)))
    params["b_lin_pad"] = jnp.pad(b_lin, ((0, 0), (0, V_PAD - VOCAB)))
    return params


@jax.jit
def text_generator_forward(params, tokens, h0, c0):
    """tokens: (B, T) int32; h0, c0: (num_layers, B, H).
    Returns (logits (B*T, V), (h (L, B, H), c (L, B, H))) like the PyTorch module."""
    B, T = tokens.shape
    pad_b = B_PAD - B

    # Tiny prep glue: time-major token ids / packed initial state, batch padded.
    tok_pad = jnp.pad(tokens.T, ((0, 0), (0, pad_b))).reshape(T * B_PAD, 1)
    tok_pad = tok_pad.astype(jnp.int32)
    state0 = jnp.concatenate(
        [jnp.pad(h0, ((0, 0), (0, pad_b), (0, 0))),
         jnp.pad(c0, ((0, 0), (0, pad_b), (0, 0)))], axis=0)      # (2L, B_PAD, H)

    logits_tm, stateT = _fused_forward(tok_pad, params, state0)

    # Reorder tiny logits slab: time-major rows (t*B_PAD + b) -> batch-major
    # rows (b*T + t), drop batch / vocab padding.  Matches
    # out.reshape(B*T, H) @ linear in the PyTorch module.
    logits = (logits_tm.reshape(T, B_PAD, V_PAD)[:, :B, :VOCAB]
              .transpose(1, 0, 2).reshape(B * T, VOCAB))
    hT = stateT[:NUM_LAYERS, :B, :]
    cT = stateT[NUM_LAYERS:, :B, :]
    return logits, (hT, cT)


# Pure-JAX reference (same math, same gate order) for a correctness check.
def reference_forward(params, tokens, h0, c0):
    H = HIDDEN
    x = jnp.take(params["embed"], tokens, axis=0)        # (B, T, E)
    hs, cs = [], []
    for layer in range(NUM_LAYERS):
        h, c = h0[layer], c0[layer]
        outs = []
        for t in range(tokens.shape[1]):
            gates = (x[:, t, :] @ params["w_ih"][layer]
                     + h @ params["w_hh"][layer] + params["b"][layer])
            i = jax.nn.sigmoid(gates[:, 0 * H:1 * H])
            f = jax.nn.sigmoid(gates[:, 1 * H:2 * H])
            o = jax.nn.sigmoid(gates[:, 2 * H:3 * H])
            g = jnp.tanh(gates[:, 3 * H:4 * H])
            c = f * c + i * g
            h = o * jnp.tanh(c)
            outs.append(h)
        x = jnp.stack(outs, axis=1)
        hs.append(h)
        cs.append(c)
    out = x.reshape(-1, H)
    logits = out @ params["w_lin"] + params["b_lin"]
    return logits, (jnp.stack(hs), jnp.stack(cs))


if __name__ == "__main__":
    key = jax.random.PRNGKey(0)
    k_p, k_tok, k_h, k_c = jax.random.split(key, 4)

    params = init_params(k_p)
    tokens = jax.random.randint(k_tok, (BATCH, SEQ), 0, VOCAB, dtype=jnp.int32)
    h0 = 0.1 * jax.random.normal(k_h, (NUM_LAYERS, BATCH, HIDDEN), jnp.float32)
    c0 = 0.1 * jax.random.normal(k_c, (NUM_LAYERS, BATCH, HIDDEN), jnp.float32)

    logits, (hT, cT) = text_generator_forward(params, tokens, h0, c0)
    jax.block_until_ready((logits, hT, cT))

    ref_logits, (ref_h, ref_c) = reference_forward(params, tokens, h0, c0)
    assert logits.shape == (BATCH * SEQ, VOCAB)
    assert hT.shape == (NUM_LAYERS, BATCH, HIDDEN)
    assert cT.shape == (NUM_LAYERS, BATCH, HIDDEN)
    assert jnp.allclose(logits, ref_logits, atol=1e-2, rtol=1e-2)
    assert jnp.allclose(hT, ref_h, atol=1e-2, rtol=1e-2)
    assert jnp.allclose(cT, ref_c, atol=1e-2, rtol=1e-2)

    print("KERNEL_OK")
</pallas_src>

<mosaic_0001>
module attributes {stable_mosaic.version = 11 : i64} {
  func.func @_fused_forward_kernel(%arg0: memref<64x1xi32, #tpu.memory_space<vmem>>, %arg1: memref<128x128xf32, #tpu.memory_space<vmem>>, %arg2: memref<64x256xf32, #tpu.memory_space<vmem>>, %arg3: memref<1x256xf32, #tpu.memory_space<vmem>>, %arg4: memref<32x128xf32, #tpu.memory_space<vmem>>, %arg5: memref<1x128xf32, #tpu.memory_space<vmem>>, %arg6: memref<4x8x32xf32, #tpu.memory_space<vmem>>, %arg7: memref<64x128xf32, #tpu.memory_space<vmem>>, %arg8: memref<4x8x32xf32, #tpu.memory_space<vmem>>) attributes {dimension_semantics = [], scalar_prefetch = 0 : i64, scratch_operands = 0 : i64, tpu.core_type = #tpu.core_type<tc>} {
    %c0 = arith.constant 0 : index
    %c0_0 = arith.constant 0 : index
    %0 = vector.load %arg0[%c0, %c0_0] : memref<64x1xi32, #tpu.memory_space<vmem>>, vector<64x1xi32>
    %1 = tpu.iota {dimensions = array<i32: 1>} : vector<64x128xi32>
    %2 = vector.broadcast %0 : vector<64x1xi32> to vector<64x128xi32>
    %3 = arith.cmpi eq, %1, %2 : vector<64x128xi32>
    %4 = arith.extui %3 : vector<64x128xi1> to vector<64x128xi32>
    %5 = arith.sitofp %4 : vector<64x128xi32> to vector<64x128xf32>
    %c0_1 = arith.constant 0 : index
    %c0_2 = arith.constant 0 : index
    %6 = vector.load %arg1[%c0_1, %c0_2] : memref<128x128xf32, #tpu.memory_space<vmem>>, vector<128x128xf32>
    %cst = arith.constant dense<0.000000e+00> : vector<64x128xf32>
    %7 = tpu.matmul %5, %6, %cst {dimension_numbers = #tpu.dot_dimension_numbers<[1], [0], [0], [1], [0, 0, 1, 1], [], []>} : vector<64x128xf32>, vector<128x128xf32>, vector<64x128xf32> -> vector<64x128xf32>
    %c0_3 = arith.constant 0 : index
    %c0_4 = arith.constant 0 : index
    %8 = vector.load %arg2[%c0_3, %c0_4] : memref<64x256xf32, #tpu.memory_space<vmem>>, vector<64x256xf32>
    %c0_5 = arith.constant 0 : index
    %c0_6 = arith.constant 0 : index
    %9 = vector.load %arg3[%c0_5, %c0_6] : memref<1x256xf32, #tpu.memory_space<vmem>>, vector<1x256xf32>
    %10 = vector.shape_cast %9 : vector<1x256xf32> to vector<1x256xf32>
    %11 = vector.broadcast %10 : vector<1x256xf32> to vector<8x256xf32>
    %c0_7 = arith.constant 0 : index
    %c0_8 = arith.constant 0 : index
    %c0_9 = arith.constant 0 : index
    %12 = vector.load %arg6[%c0_7, %c0_8, %c0_9] : memref<4x8x32xf32, #tpu.memory_space<vmem>>, vector<1x8x32xf32>
    %13 = vector.shape_cast %12 : vector<1x8x32xf32> to vector<8x32xf32>
    %c1 = arith.constant 1 : index
    %c0_10 = arith.constant 0 : index
    %c0_11 = arith.constant 0 : index
    %14 = vector.load %arg6[%c1, %c0_10, %c0_11] : memref<4x8x32xf32, #tpu.memory_space<vmem>>, vector<1x8x32xf32>
    %15 = vector.shape_cast %14 : vector<1x8x32xf32> to vector<8x32xf32>
    %c2 = arith.constant 2 : index
    %c0_12 = arith.constant 0 : index
    %c0_13 = arith.constant 0 : index
    %16 = vector.load %arg6[%c2, %c0_12, %c0_13] : memref<4x8x32xf32, #tpu.memory_space<vmem>>, vector<1x8x32xf32>
    %17 = vector.shape_cast %16 : vector<1x8x32xf32> to vector<8x32xf32>
    %c3 = arith.constant 3 : index
    %c0_14 = arith.constant 0 : index
    %c0_15 = arith.constant 0 : index
    %18 = vector.load %arg6[%c3, %c0_14, %c0_15] : memref<4x8x32xf32, #tpu.memory_space<vmem>>, vector<1x8x32xf32>
    %19 = vector.shape_cast %18 : vector<1x8x32xf32> to vector<8x32xf32>
    %20 = tpu.concatenate %13, %15 in 1 : vector<8x32xf32>, vector<8x32xf32> -> vector<8x64xf32>
    %cst_16 = arith.constant dense<0.000000e+00> : vector<8x256xf32>
    %21 = tpu.matmul %20, %8, %cst_16 {dimension_numbers = #tpu.dot_dimension_numbers<[1], [0], [0], [1], [0, 0, 1, 1], [], []>} : vector<8x64xf32>, vector<64x256xf32>, vector<8x256xf32> -> vector<8x256xf32>
    %22 = arith.addf %21, %11 : vector<8x256xf32>
    %23 = vector.extract_strided_slice %22 {offsets = [0, 0], sizes = [8, 128], strides = [1, 1]} : vector<8x256xf32> to vector<8x128xf32>
    %24 = vector.extract_strided_slice %7 {offsets = [0, 0], sizes = [8, 128], strides = [1, 1]} : vector<64x128xf32> to vector<8x128xf32>
    %25 = arith.addf %23, %24 : vector<8x128xf32>
    %26 = vector.extract_strided_slice %25 {offsets = [0, 0], sizes = [8, 96], strides = [1, 1]} : vector<8x128xf32> to vector<8x96xf32>
    %27 = arith.negf %26 : vector<8x96xf32>
    %28 = math.exp %27 : vector<8x96xf32>
    %cst_17 = arith.constant 1.000000e+00 : f32
    %29 = vector.broadcast %cst_17 : f32 to vector<8x96xf32>
    %30 = arith.addf %29, %28 : vector<8x96xf32>
    %31 = arith.divf %29, %30 : vector<8x96xf32>
    %32 = vector.extract_strided_slice %31 {offsets = [0, 0], sizes = [8, 32], strides = [1, 1]} : vector<8x96xf32> to vector<8x32xf32>
    %33 = vector.extract_strided_slice %31 {offsets = [0, 32], sizes = [8, 32], strides = [1, 1]} : vector<8x96xf32> to vector<8x32xf32>
    %34 = vector.extract_strided_slice %31 {offsets = [0, 64], sizes = [8, 32], strides = [1, 1]} : vector<8x96xf32> to vector<8x32xf32>
    %35 = vector.extract_strided_slice %25 {offsets = [0, 96], sizes = [8, 32], strides = [1, 1]} : vector<8x128xf32> to vector<8x32xf32>
    %36 = math.tanh %35 : vector<8x32xf32>
    %37 = arith.mulf %33, %17 : vector<8x32xf32>
    %38 = arith.mulf %32, %36 : vector<8x32xf32>
    %39 = arith.addf %37, %38 : vector<8x32xf32>
    %40 = math.tanh %39 : vector<8x32xf32>
    %41 = arith.mulf %34, %40 : vector<8x32xf32>
    %42 = tpu.concatenate %41, %15 in 1 : vector<8x32xf32>, vector<8x32xf32> -> vector<8x64xf32>
    %cst_18 = arith.constant dense<0.000000e+00> : vector<8x256xf32>
    %43 = tpu.matmul %42, %8, %cst_18 {dimension_numbers = #tpu.dot_dimension_numbers<[1], [0], [0], [1], [0, 0, 1, 1], [], []>} : vector<8x64xf32>, vector<64x256xf32>, vector<8x256xf32> -> vector<8x256xf32>
    %44 = arith.addf %43, %11 : vector<8x256xf32>
    %45 = vector.extract_strided_slice %44 {offsets = [0, 0], sizes = [8, 128], strides = [1, 1]} : vector<8x256xf32> to vector<8x128xf32>
    %46 = vector.extract_strided_slice %7 {offsets = [8, 0], sizes = [8, 128], strides = [1, 1]} : vector<64x128xf32> to vector<8x128xf32>
    %47 = arith.addf %45, %46 : vector<8x128xf32>
    %48 = vector.extract_strided_slice %47 {offsets = [0, 0], sizes = [8, 96], strides = [1, 1]} : vector<8x128xf32> to vector<8x96xf32>
    %49 = arith.negf %48 : vector<8x96xf32>
    %50 = math.exp %49 : vector<8x96xf32>
    %cst_19 = arith.constant 1.000000e+00 : f32
    %51 = vector.broadcast %cst_19 : f32 to vector<8x96xf32>
    %52 = arith.addf %51, %50 : vector<8x96xf32>
    %53 = arith.divf %51, %52 : vector<8x96xf32>
    %54 = vector.extract_strided_slice %53 {offsets = [0, 0], sizes = [8, 32], strides = [1, 1]} : vector<8x96xf32> to vector<8x32xf32>
    %55 = vector.extract_strided_slice %53 {offsets = [0, 32], sizes = [8, 32], strides = [1, 1]} : vector<8x96xf32> to vector<8x32xf32>
    %56 = vector.extract_strided_slice %53 {offsets = [0, 64], sizes = [8, 32], strides = [1, 1]} : vector<8x96xf32> to vector<8x32xf32>
    %57 = vector.extract_strided_slice %47 {offsets = [0, 96], sizes = [8, 32], strides = [1, 1]} : vector<8x128xf32> to vector<8x32xf32>
    %58 = math.tanh %57 : vector<8x32xf32>
    %59 = arith.mulf %55, %39 : vector<8x32xf32>
    %60 = arith.mulf %54, %58 : vector<8x32xf32>
    %61 = arith.addf %59, %60 : vector<8x32xf32>
    %62 = math.tanh %61 : vector<8x32xf32>
    %63 = arith.mulf %56, %62 : vector<8x32xf32>
    %64 = vector.extract_strided_slice %44 {offsets = [0, 128], sizes = [8, 128], strides = [1, 1]} : vector<8x256xf32> to vector<8x128xf32>
    %65 = vector.extract_strided_slice %64 {offsets = [0, 0], sizes = [8, 96], strides = [1, 1]} : vector<8x128xf32> to vector<8x96xf32>
    %66 = arith.negf %65 : vector<8x96xf32>
    %67 = math.exp %66 : vector<8x96xf32>
    %cst_20 = arith.constant 1.000000e+00 : f32
    %68 = vector.broadcast %cst_20 : f32 to vector<8x96xf32>
    %69 = arith.addf %68, %67 : vector<8x96xf32>
    %70 = arith.divf %68, %69 : vector<8x96xf32>
    %71 = vector.extract_strided_slice %70 {offsets = [0, 0], sizes = [8, 32], strides = [1, 1]} : vector<8x96xf32> to vector<8x32xf32>
    %72 = vector.extract_strided_slice %70 {offsets = [0, 32], sizes = [8, 32], strides = [1, 1]} : vector<8x96xf32> to vector<8x32xf32>
    %73 = vector.extract_strided_slice %70 {offsets = [0, 64], sizes = [8, 32], strides = [1, 1]} : vector<8x96xf32> to vector<8x32xf32>
    %74 = vector.extract_strided_slice %64 {offsets = [0, 96], sizes = [8, 32], strides = [1, 1]} : vector<8x128xf32> to vector<8x32xf32>
    %75 = math.tanh %74 : vector<8x32xf32>
    %76 = arith.mulf %72, %19 : vector<8x32xf32>
    %77 = arith.mulf %71, %75 : vector<8x32xf32>
    %78 = arith.addf %76, %77 : vector<8x32xf32>
    %79 = math.tanh %78 : vector<8x32xf32>
    %80 = arith.mulf %73, %79 : vector<8x32xf32>
    %81 = tpu.concatenate %63, %80 in 1 : vector<8x32xf32>, vector<8x32xf32> -> vector<8x64xf32>
    %cst_21 = arith.constant dense<0.000000e+00> : vector<8x256xf32>
    %82 = tpu.matmul %81, %8, %cst_21 {dimension_numbers = #tpu.dot_dimension_numbers<[1], [0], [0], [1], [0, 0, 1, 1], [], []>} : vector<8x64xf32>, vector<64x256xf32>, vector<8x256xf32> -> vector<8x256xf32>
    %83 = arith.addf %82, %11 : vector<8x256xf32>
    %84 = vector.extract_strided_slice %83 {offsets = [0, 0], sizes = [8, 128], strides = [1, 1]} : vector<8x256xf32> to vector<8x128xf32>
    %85 = vector.extract_strided_slice %7 {offsets = [16, 0], sizes = [8, 128], strides = [1, 1]} : vector<64x128xf32> to vector<8x128xf32>
    %86 = arith.addf %84, %85 : vector<8x128xf32>
    %87 = vector.extract_strided_slice %86 {offsets = [0, 0], sizes = [8, 96], strides = [1, 1]} : vector<8x128xf32> to vector<8x96xf32>
    %88 = arith.negf %87 : vector<8x96xf32>
    %89 = math.exp %88 : vector<8x96xf32>
    %cst_22 = arith.constant 1.000000e+00 : f32
    %90 = vector.broadcast %cst_22 : f32 to vector<8x96xf32>
    %91 = arith.addf %90, %89 : vector<8x96xf32>
    %92 = arith.divf %90, %91 : vector<8x96xf32>
    %93 = vector.extract_strided_slice %92 {offsets = [0, 0], sizes = [8, 32], strides = [1, 1]} : vector<8x96xf32> to vector<8x32xf32>
    %94 = vector.extract_strided_slice %92 {offsets = [0, 32], sizes = [8, 32], strides = [1, 1]} : vector<8x96xf32> to vector<8x32xf32>
    %95 = vector.extract_strided_slice %92 {offsets = [0, 64], sizes = [8, 32], strides = [1, 1]} : vector<8x96xf32> to vector<8x32xf32>
    %96 = vector.extract_strided_slice %86 {offsets = [0, 96], sizes = [8, 32], strides = [1, 1]} : vector<8x128xf32> to vector<8x32xf32>
    %97 = math.tanh %96 : vector<8x32xf32>
    %98 = arith.mulf %94, %61 : vector<8x32xf32>
    %99 = arith.mulf %93, %97 : vector<8x32xf32>
    %100 = arith.addf %98, %99 : vector<8x32xf32>
    %101 = math.tanh %100 : vector<8x32xf32>
    %102 = arith.mulf %95, %101 : vector<8x32xf32>
    %103 = vector.extract_strided_slice %83 {offsets = [0, 128], sizes = [8, 128], strides = [1, 1]} : vector<8x256xf32> to vector<8x128xf32>
    %104 = vector.extract_strided_slice %103 {offsets = [0, 0], sizes = [8, 96], strides = [1, 1]} : vector<8x128xf32> to vector<8x96xf32>
    %105 = arith.negf %104 : vector<8x96xf32>
    %106 = math.exp %105 : vector<8x96xf32>
    %cst_23 = arith.constant 1.000000e+00 : f32
    %107 = vector.broadcast %cst_23 : f32 to vector<8x96xf32>
    %108 = arith.addf %107, %106 : vector<8x96xf32>
    %109 = arith.divf %107, %108 : vector<8x96xf32>
    %110 = vector.extract_strided_slice %109 {offsets = [0, 0], sizes = [8, 32], strides = [1, 1]} : vector<8x96xf32> to vector<8x32xf32>
    %111 = vector.extract_strided_slice %109 {offsets = [0, 32], sizes = [8, 32], strides = [1, 1]} : vector<8x96xf32> to vector<8x32xf32>
    %112 = vector.extract_strided_slice %109 {offsets = [0, 64], sizes = [8, 32], strides = [1, 1]} : vector<8x96xf32> to vector<8x32xf32>
    %113 = vector.extract_strided_slice %103 {offsets = [0, 96], sizes = [8, 32], strides = [1, 1]} : vector<8x128xf32> to vector<8x32xf32>
    %114 = math.tanh %113 : vector<8x32xf32>
    %115 = arith.mulf %111, %78 : vector<8x32xf32>
    %116 = arith.mulf %110, %114 : vector<8x32xf32>
    %117 = arith.addf %115, %116 : vector<8x32xf32>
    %118 = math.tanh %117 : vector<8x32xf32>
    %119 = arith.mulf %112, %118 : vector<8x32xf32>
    %120 = tpu.concatenate %102, %119 in 1 : vector<8x32xf32>, vector<8x32xf32> -> vector<8x64xf32>
    %cst_24 = arith.constant dense<0.000000e+00> : vector<8x256xf32>
    %121 = tpu.matmul %120, %8, %cst_24 {dimension_numbers = #tpu.dot_dimension_numbers<[1], [0], [0], [1], [0, 0, 1, 1], [], []>} : vector<8x64xf32>, vector<64x256xf32>, vector<8x256xf32> -> vector<8x256xf32>
    %122 = arith.addf %121, %11 : vector<8x256xf32>
    %123 = vector.extract_strided_slice %122 {offsets = [0, 0], sizes = [8, 128], strides = [1, 1]} : vector<8x256xf32> to vector<8x128xf32>
    %124 = vector.extract_strided_slice %7 {offsets = [24, 0], sizes = [8, 128], strides = [1, 1]} : vector<64x128xf32> to vector<8x128xf32>
    %125 = arith.addf %123, %124 : vector<8x128xf32>
    %126 = vector.extract_strided_slice %125 {offsets = [0, 0], sizes = [8, 96], strides = [1, 1]} : vector<8x128xf32> to vector<8x96xf32>
    %127 = arith.negf %126 : vector<8x96xf32>
    %128 = math.exp %127 : vector<8x96xf32>
    %cst_25 = arith.constant 1.000000e+00 : f32
    %129 = vector.broadcast %cst_25 : f32 to vector<8x96xf32>
    %130 = arith.addf %129, %128 : vector<8x96xf32>
    %131 = arith.divf %129, %130 : vector<8x96xf32>
    %132 = vector.extract_strided_slice %131 {offsets = [0, 0], sizes = [8, 32], strides = [1, 1]} : vector<8x96xf32> to vector<8x32xf32>
    %133 = vector.extract_strided_slice %131 {offsets = [0, 32], sizes = [8, 32], strides = [1, 1]} : vector<8x96xf32> to vector<8x32xf32>
    %134 = vector.extract_strided_slice %131 {offsets = [0, 64], sizes = [8, 32], strides = [1, 1]} : vector<8x96xf32> to vector<8x32xf32>
    %135 = vector.extract_strided_slice %125 {offsets = [0, 96], sizes = [8, 32], strides = [1, 1]} : vector<8x128xf32> to vector<8x32xf32>
    %136 = math.tanh %135 : vector<8x32xf32>
    %137 = arith.mulf %133, %100 : vector<8x32xf32>
    %138 = arith.mulf %132, %136 : vector<8x32xf32>
    %139 = arith.addf %137, %138 : vector<8x32xf32>
    %140 = math.tanh %139 : vector<8x32xf32>
    %141 = arith.mulf %134, %140 : vector<8x32xf32>
    %142 = vector.extract_strided_slice %122 {offsets = [0, 128], sizes = [8, 128], strides = [1, 1]} : vector<8x256xf32> to vector<8x128xf32>
    %143 = vector.extract_strided_slice %142 {offsets = [0, 0], sizes = [8, 96], strides = [1, 1]} : vector<8x128xf32> to vector<8x96xf32>
    %144 = arith.negf %143 : vector<8x96xf32>
    %145 = math.exp %144 : vector<8x96xf32>
    %cst_26 = arith.constant 1.000000e+00 : f32
    %146 = vector.broadcast %cst_26 : f32 to vector<8x96xf32>
    %147 = arith.addf %146, %145 : vector<8x96xf32>
    %148 = arith.divf %146, %147 : vector<8x96xf32>
    %149 = vector.extract_strided_slice %148 {offsets = [0, 0], sizes = [8, 32], strides = [1, 1]} : vector<8x96xf32> to vector<8x32xf32>
    %150 = vector.extract_strided_slice %148 {offsets = [0, 32], sizes = [8, 32], strides = [1, 1]} : vector<8x96xf32> to vector<8x32xf32>
    %151 = vector.extract_strided_slice %148 {offsets = [0, 64], sizes = [8, 32], strides = [1, 1]} : vector<8x96xf32> to vector<8x32xf32>
    %152 = vector.extract_strided_slice %142 {offsets = [0, 96], sizes = [8, 32], strides = [1, 1]} : vector<8x128xf32> to vector<8x32xf32>
    %153 = math.tanh %152 : vector<8x32xf32>
    %154 = arith.mulf %150, %117 : vector<8x32xf32>
    %155 = arith.mulf %149, %153 : vector<8x32xf32>
    %156 = arith.addf %154, %155 : vector<8x32xf32>
    %157 = math.tanh %156 : vector<8x32xf32>
    %158 = arith.mulf %151, %157 : vector<8x32xf32>
    %159 = tpu.concatenate %141, %158 in 1 : vector<8x32xf32>, vector<8x32xf32> -> vector<8x64xf32>
    %cst_27 = arith.constant dense<0.000000e+00> : vector<8x256xf32>
    %160 = tpu.matmul %159, %8, %cst_27 {dimension_numbers = #tpu.dot_dimension_numbers<[1], [0], [0], [1], [0, 0, 1, 1], [], []>} : vector<8x64xf32>, vector<64x256xf32>, vector<8x256xf32> -> vector<8x256xf32>
    %161 = arith.addf %160, %11 : vector<8x256xf32>
    %162 = vector.extract_strided_slice %161 {offsets = [0, 0], sizes = [8, 128], strides = [1, 1]} : vector<8x256xf32> to vector<8x128xf32>
    %163 = vector.extract_strided_slice %7 {offsets = [32, 0], sizes = [8, 128], strides = [1, 1]} : vector<64x128xf32> to vector<8x128xf32>
    %164 = arith.addf %162, %163 : vector<8x128xf32>
    %165 = vector.extract_strided_slice %164 {offsets = [0, 0], sizes = [8, 96], strides = [1, 1]} : vector<8x128xf32> to vector<8x96xf32>
    %166 = arith.negf %165 : vector<8x96xf32>
    %167 = math.exp %166 : vector<8x96xf32>
    %cst_28 = arith.constant 1.000000e+00 : f32
    %168 = vector.broadcast %cst_28 : f32 to vector<8x96xf32>
    %169 = arith.addf %168, %167 : vector<8x96xf32>
    %170 = arith.divf %168, %169 : vector<8x96xf32>
    %171 = vector.extract_strided_slice %170 {offsets = [0, 0], sizes = [8, 32], strides = [1, 1]} : vector<8x96xf32> to vector<8x32xf32>
    %172 = vector.extract_strided_slice %170 {offsets = [0, 32], sizes = [8, 32], strides = [1, 1]} : vector<8x96xf32> to vector<8x32xf32>
    %173 = vector.extract_strided_slice %170 {offsets = [0, 64], sizes = [8, 32], strides = [1, 1]} : vector<8x96xf32> to vector<8x32xf32>
    %174 = vector.extract_strided_slice %164 {offsets = [0, 96], sizes = [8, 32], strides = [1, 1]} : vector<8x128xf32> to vector<8x32xf32>
    %175 = math.tanh %174 : vector<8x32xf32>
    %176 = arith.mulf %172, %139 : vector<8x32xf32>
    %177 = arith.mulf %171, %175 : vector<8x32xf32>
    %178 = arith.addf %176, %177 : vector<8x32xf32>
    %179 = math.tanh %178 : vector<8x32xf32>
    %180 = arith.mulf %173, %179 : vector<8x32xf32>
    %181 = vector.extract_strided_slice %161 {offsets = [0, 128], sizes = [8, 128], strides = [1, 1]} : vector<8x256xf32> to vector<8x128xf32>
    %182 = vector.extract_strided_slice %181 {offsets = [0, 0], sizes = [8, 96], strides = [1, 1]} : vector<8x128xf32> to vector<8x96xf32>
    %183 = arith.negf %182 : vector<8x96xf32>
    %184 = math.exp %183 : vector<8x96xf32>
    %cst_29 = arith.constant 1.000000e+00 : f32
    %185 = vector.broadcast %cst_29 : f32 to vector<8x96xf32>
    %186 = arith.addf %185, %184 : vector<8x96xf32>
    %187 = arith.divf %185, %186 : vector<8x96xf32>
    %188 = vector.extract_strided_slice %187 {offsets = [0, 0], sizes = [8, 32], strides = [1, 1]} : vector<8x96xf32> to vector<8x32xf32>
    %189 = vector.extract_strided_slice %187 {offsets = [0, 32], sizes = [8, 32], strides = [1, 1]} : vector<8x96xf32> to vector<8x32xf32>
    %190 = vector.extract_strided_slice %187 {offsets = [0, 64], sizes = [8, 32], strides = [1, 1]} : vector<8x96xf32> to vector<8x32xf32>
    %191 = vector.extract_strided_slice %181 {offsets = [0, 96], sizes = [8, 32], strides = [1, 1]} : vector<8x128xf32> to vector<8x32xf32>
    %192 = math.tanh %191 : vector<8x32xf32>
    %193 = arith.mulf %189, %156 : vector<8x32xf32>
    %194 = arith.mulf %188, %192 : vector<8x32xf32>
    %195 = arith.addf %193, %194 : vector<8x32xf32>
    %196 = math.tanh %195 : vector<8x32xf32>
    %197 = arith.mulf %190, %196 : vector<8x32xf32>
    %198 = tpu.concatenate %180, %197 in 1 : vector<8x32xf32>, vector<8x32xf32> -> vector<8x64xf32>
    %cst_30 = arith.constant dense<0.000000e+00> : vector<8x256xf32>
    %199 = tpu.matmul %198, %8, %cst_30 {dimension_numbers = #tpu.dot_dimension_numbers<[1], [0], [0], [1], [0, 0, 1, 1], [], []>} : vector<8x64xf32>, vector<64x256xf32>, vector<8x256xf32> -> vector<8x256xf32>
    %200 = arith.addf %199, %11 : vector<8x256xf32>
    %201 = vector.extract_strided_slice %200 {offsets = [0, 0], sizes = [8, 128], strides = [1, 1]} : vector<8x256xf32> to vector<8x128xf32>
    %202 = vector.extract_strided_slice %7 {offsets = [40, 0], sizes = [8, 128], strides = [1, 1]} : vector<64x128xf32> to vector<8x128xf32>
    %203 = arith.addf %201, %202 : vector<8x128xf32>
    %204 = vector.extract_strided_slice %203 {offsets = [0, 0], sizes = [8, 96], strides = [1, 1]} : vector<8x128xf32> to vector<8x96xf32>
    %205 = arith.negf %204 : vector<8x96xf32>
    %206 = math.exp %205 : vector<8x96xf32>
    %cst_31 = arith.constant 1.000000e+00 : f32
    %207 = vector.broadcast %cst_31 : f32 to vector<8x96xf32>
    %208 = arith.addf %207, %206 : vector<8x96xf32>
    %209 = arith.divf %207, %208 : vector<8x96xf32>
    %210 = vector.extract_strided_slice %209 {offsets = [0, 0], sizes = [8, 32], strides = [1, 1]} : vector<8x96xf32> to vector<8x32xf32>
    %211 = vector.extract_strided_slice %209 {offsets = [0, 32], sizes = [8, 32], strides = [1, 1]} : vector<8x96xf32> to vector<8x32xf32>
    %212 = vector.extract_strided_slice %209 {offsets = [0, 64], sizes = [8, 32], strides = [1, 1]} : vector<8x96xf32> to vector<8x32xf32>
    %213 = vector.extract_strided_slice %203 {offsets = [0, 96], sizes = [8, 32], strides = [1, 1]} : vector<8x128xf32> to vector<8x32xf32>
    %214 = math.tanh %213 : vector<8x32xf32>
    %215 = arith.mulf %211, %178 : vector<8x32xf32>
    %216 = arith.mulf %210, %214 : vector<8x32xf32>
    %217 = arith.addf %215, %216 : vector<8x32xf32>
    %218 = math.tanh %217 : vector<8x32xf32>
    %219 = arith.mulf %212, %218 : vector<8x32xf32>
    %220 = vector.extract_strided_slice %200 {offsets = [0, 128], sizes = [8, 128], strides = [1, 1]} : vector<8x256xf32> to vector<8x128xf32>
    %221 = vector.extract_strided_slice %220 {offsets = [0, 0], sizes = [8, 96], strides = [1, 1]} : vector<8x128xf32> to vector<8x96xf32>
    %222 = arith.negf %221 : vector<8x96xf32>
    %223 = math.exp %222 : vector<8x96xf32>
    %cst_32 = arith.constant 1.000000e+00 : f32
    %224 = vector.broadcast %cst_32 : f32 to vector<8x96xf32>
    %225 = arith.addf %224, %223 : vector<8x96xf32>
    %226 = arith.divf %224, %225 : vector<8x96xf32>
    %227 = vector.extract_strided_slice %226 {offsets = [0, 0], sizes = [8, 32], strides = [1, 1]} : vector<8x96xf32> to vector<8x32xf32>
    %228 = vector.extract_strided_slice %226 {offsets = [0, 32], sizes = [8, 32], strides = [1, 1]} : vector<8x96xf32> to vector<8x32xf32>
    %229 = vector.extract_strided_slice %226 {offsets = [0, 64], sizes = [8, 32], strides = [1, 1]} : vector<8x96xf32> to vector<8x32xf32>
    %230 = vector.extract_strided_slice %220 {offsets = [0, 96], sizes = [8, 32], strides = [1, 1]} : vector<8x128xf32> to vector<8x32xf32>
    %231 = math.tanh %230 : vector<8x32xf32>
    %232 = arith.mulf %228, %195 : vector<8x32xf32>
    %233 = arith.mulf %227, %231 : vector<8x32xf32>
    %234 = arith.addf %232, %233 : vector<8x32xf32>
    %235 = math.tanh %234 : vector<8x32xf32>
    %236 = arith.mulf %229, %235 : vector<8x32xf32>
    %237 = tpu.concatenate %219, %236 in 1 : vector<8x32xf32>, vector<8x32xf32> -> vector<8x64xf32>
    %cst_33 = arith.constant dense<0.000000e+00> : vector<8x256xf32>
    %238 = tpu.matmul %237, %8, %cst_33 {dimension_numbers = #tpu.dot_dimension_numbers<[1], [0], [0], [1], [0, 0, 1, 1], [], []>} : vector<8x64xf32>, vector<64x256xf32>, vector<8x256xf32> -> vector<8x256xf32>
    %239 = arith.addf %238, %11 : vector<8x256xf32>
    %240 = vector.extract_strided_slice %239 {offsets = [0, 0], sizes = [8, 128], strides = [1, 1]} : vector<8x256xf32> to vector<8x128xf32>
    %241 = vector.extract_strided_slice %7 {offsets = [48, 0], sizes = [8, 128], strides = [1, 1]} : vector<64x128xf32> to vector<8x128xf32>
    %242 = arith.addf %240, %241 : vector<8x128xf32>
    %243 = vector.extract_strided_slice %242 {offsets = [0, 0], sizes = [8, 96], strides = [1, 1]} : vector<8x128xf32> to vector<8x96xf32>
    %244 = arith.negf %243 : vector<8x96xf32>
    %245 = math.exp %244 : vector<8x96xf32>
    %cst_34 = arith.constant 1.000000e+00 : f32
    %246 = vector.broadcast %cst_34 : f32 to vector<8x96xf32>
    %247 = arith.addf %246, %245 : vector<8x96xf32>
    %248 = arith.divf %246, %247 : vector<8x96xf32>
    %249 = vector.extract_strided_slice %248 {offsets = [0, 0], sizes = [8, 32], strides = [1, 1]} : vector<8x96xf32> to vector<8x32xf32>
    %250 = vector.extract_strided_slice %248 {offsets = [0, 32], sizes = [8, 32], strides = [1, 1]} : vector<8x96xf32> to vector<8x32xf32>
    %251 = vector.extract_strided_slice %248 {offsets = [0, 64], sizes = [8, 32], strides = [1, 1]} : vector<8x96xf32> to vector<8x32xf32>
    %252 = vector.extract_strided_slice %242 {offsets = [0, 96], sizes = [8, 32], strides = [1, 1]} : vector<8x128xf32> to vector<8x32xf32>
    %253 = math.tanh %252 : vector<8x32xf32>
    %254 = arith.mulf %250, %217 : vector<8x32xf32>
    %255 = arith.mulf %249, %253 : vector<8x32xf32>
    %256 = arith.addf %254, %255 : vector<8x32xf32>
    %257 = math.tanh %256 : vector<8x32xf32>
    %258 = arith.mulf %251, %257 : vector<8x32xf32>
    %259 = vector.extract_strided_slice %239 {offsets = [0, 128], sizes = [8, 128], strides = [1, 1]} : vector<8x256xf32> to vector<8x128xf32>
    %260 = vector.extract_strided_slice %259 {offsets = [0, 0], sizes = [8, 96], strides = [1, 1]} : vector<8x128xf32> to vector<8x96xf32>
    %261 = arith.negf %260 : vector<8x96xf32>
    %262 = math.exp %261 : vector<8x96xf32>
    %cst_35 = arith.constant 1.000000e+00 : f32
    %263 = vector.broadcast %cst_35 : f32 to vector<8x96xf32>
    %264 = arith.addf %263, %262 : vector<8x96xf32>
    %265 = arith.divf %263, %264 : vector<8x96xf32>
    %266 = vector.extract_strided_slice %265 {offsets = [0, 0], sizes = [8, 32], strides = [1, 1]} : vector<8x96xf32> to vector<8x32xf32>
    %267 = vector.extract_strided_slice %265 {offsets = [0, 32], sizes = [8, 32], strides = [1, 1]} : vector<8x96xf32> to vector<8x32xf32>
    %268 = vector.extract_strided_slice %265 {offsets = [0, 64], sizes = [8, 32], strides = [1, 1]} : vector<8x96xf32> to vector<8x32xf32>
    %269 = vector.extract_strided_slice %259 {offsets = [0, 96], sizes = [8, 32], strides = [1, 1]} : vector<8x128xf32> to vector<8x32xf32>
    %270 = math.tanh %269 : vector<8x32xf32>
    %271 = arith.mulf %267, %234 : vector<8x32xf32>
    %272 = arith.mulf %266, %270 : vector<8x32xf32>
    %273 = arith.addf %271, %272 : vector<8x32xf32>
    %274 = math.tanh %273 : vector<8x32xf32>
    %275 = arith.mulf %268, %274 : vector<8x32xf32>
    %276 = tpu.concatenate %258, %275 in 1 : vector<8x32xf32>, vector<8x32xf32> -> vector<8x64xf32>
    %cst_36 = arith.constant dense<0.000000e+00> : vector<8x256xf32>
    %277 = tpu.matmul %276, %8, %cst_36 {dimension_numbers = #tpu.dot_dimension_numbers<[1], [0], [0], [1], [0, 0, 1, 1], [], []>} : vector<8x64xf32>, vector<64x256xf32>, vector<8x256xf32> -> vector<8x256xf32>
    %278 = arith.addf %277, %11 : vector<8x256xf32>
    %279 = vector.extract_strided_slice %278 {offsets = [0, 0], sizes = [8, 128], strides = [1, 1]} : vector<8x256xf32> to vector<8x128xf32>
    %280 = vector.extract_strided_slice %7 {offsets = [56, 0], sizes = [8, 128], strides = [1, 1]} : vector<64x128xf32> to vector<8x128xf32>
    %281 = arith.addf %279, %280 : vector<8x128xf32>
    %282 = vector.extract_strided_slice %281 {offsets = [0, 0], sizes = [8, 96], strides = [1, 1]} : vector<8x128xf32> to vector<8x96xf32>
    %283 = arith.negf %282 : vector<8x96xf32>
    %284 = math.exp %283 : vector<8x96xf32>
    %cst_37 = arith.constant 1.000000e+00 : f32
    %285 = vector.broadcast %cst_37 : f32 to vector<8x96xf32>
    %286 = arith.addf %285, %284 : vector<8x96xf32>
    %287 = arith.divf %285, %286 : vector<8x96xf32>
    %288 = vector.extract_strided_slice %287 {offsets = [0, 0], sizes = [8, 32], strides = [1, 1]} : vector<8x96xf32> to vector<8x32xf32>
    %289 = vector.extract_strided_slice %287 {offsets = [0, 32], sizes = [8, 32], strides = [1, 1]} : vector<8x96xf32> to vector<8x32xf32>
    %290 = vector.extract_strided_slice %287 {offsets = [0, 64], sizes = [8, 32], strides = [1, 1]} : vector<8x96xf32> to vector<8x32xf32>
    %291 = vector.extract_strided_slice %281 {offsets = [0, 96], sizes = [8, 32], strides = [1, 1]} : vector<8x128xf32> to vector<8x32xf32>
    %292 = math.tanh %291 : vector<8x32xf32>
    %293 = arith.mulf %289, %256 : vector<8x32xf32>
    %294 = arith.mulf %288, %292 : vector<8x32xf32>
    %295 = arith.addf %293, %294 : vector<8x32xf32>
    %296 = math.tanh %295 : vector<8x32xf32>
    %297 = arith.mulf %290, %296 : vector<8x32xf32>
    %298 = vector.extract_strided_slice %278 {offsets = [0, 128], sizes = [8, 128], strides = [1, 1]} : vector<8x256xf32> to vector<8x128xf32>
    %299 = vector.extract_strided_slice %298 {offsets = [0, 0], sizes = [8, 96], strides = [1, 1]} : vector<8x128xf32> to vector<8x96xf32>
    %300 = arith.negf %299 : vector<8x96xf32>
    %301 = math.exp %300 : vector<8x96xf32>
    %cst_38 = arith.constant 1.000000e+00 : f32
    %302 = vector.broadcast %cst_38 : f32 to vector<8x96xf32>
    %303 = arith.addf %302, %301 : vector<8x96xf32>
    %304 = arith.divf %302, %303 : vector<8x96xf32>
    %305 = vector.extract_strided_slice %304 {offsets = [0, 0], sizes = [8, 32], strides = [1, 1]} : vector<8x96xf32> to vector<8x32xf32>
    %306 = vector.extract_strided_slice %304 {offsets = [0, 32], sizes = [8, 32], strides = [1, 1]} : vector<8x96xf32> to vector<8x32xf32>
    %307 = vector.extract_strided_slice %304 {offsets = [0, 64], sizes = [8, 32], strides = [1, 1]} : vector<8x96xf32> to vector<8x32xf32>
    %308 = vector.extract_strided_slice %298 {offsets = [0, 96], sizes = [8, 32], strides = [1, 1]} : vector<8x128xf32> to vector<8x32xf32>
    %309 = math.tanh %308 : vector<8x32xf32>
    %310 = arith.mulf %306, %273 : vector<8x32xf32>
    %311 = arith.mulf %305, %309 : vector<8x32xf32>
    %312 = arith.addf %310, %311 : vector<8x32xf32>
    %313 = math.tanh %312 : vector<8x32xf32>
    %314 = arith.mulf %307, %313 : vector<8x32xf32>
    %315 = tpu.concatenate %297, %314 in 1 : vector<8x32xf32>, vector<8x32xf32> -> vector<8x64xf32>
    %cst_39 = arith.constant dense<0.000000e+00> : vector<8x256xf32>
    %316 = tpu.matmul %315, %8, %cst_39 {dimension_numbers = #tpu.dot_dimension_numbers<[1], [0], [0], [1], [0, 0, 1, 1], [], []>} : vector<8x64xf32>, vector<64x256xf32>, vector<8x256xf32> -> vector<8x256xf32>
    %317 = arith.addf %316, %11 : vector<8x256xf32>
    %318 = vector.extract_strided_slice %317 {offsets = [0, 128], sizes = [8, 128], strides = [1, 1]} : vector<8x256xf32> to vector<8x128xf32>
    %319 = vector.extract_strided_slice %318 {offsets = [0, 0], sizes = [8, 96], strides = [1, 1]} : vector<8x128xf32> to vector<8x96xf32>
    %320 = arith.negf %319 : vector<8x96xf32>
    %321 = math.exp %320 : vector<8x96xf32>
    %cst_40 = arith.constant 1.000000e+00 : f32
    %322 = vector.broadcast %cst_40 : f32 to vector<8x96xf32>
    %323 = arith.addf %322, %321 : vector<8x96xf32>
    %324 = arith.divf %322, %323 : vector<8x96xf32>
    %325 = vector.extract_strided_slice %324 {offsets = [0, 0], sizes = [8, 32], strides = [1, 1]} : vector<8x96xf32> to vector<8x32xf32>
    %326 = vector.extract_strided_slice %324 {offsets = [0, 32], sizes = [8, 32], strides = [1, 1]} : vector<8x96xf32> to vector<8x32xf32>
    %327 = vector.extract_strided_slice %324 {offsets = [0, 64], sizes = [8, 32], strides = [1, 1]} : vector<8x96xf32> to vector<8x32xf32>
    %328 = vector.extract_strided_slice %318 {offsets = [0, 96], sizes = [8, 32], strides = [1, 1]} : vector<8x128xf32> to vector<8x32xf32>
    %329 = math.tanh %328 : vector<8x32xf32>
    %330 = arith.mulf %326, %312 : vector<8x32xf32>
    %331 = arith.mulf %325, %329 : vector<8x32xf32>
    %332 = arith.addf %330, %331 : vector<8x32xf32>
    %333 = math.tanh %332 : vector<8x32xf32>
    %334 = arith.mulf %327, %333 : vector<8x32xf32>
    %335 = tpu.concatenate %80, %119, %158, %197, %236, %275, %314, %334 in 0 : vector<8x32xf32>, vector<8x32xf32>, vector<8x32xf32>, vector<8x32xf32>, vector<8x32xf32>, vector<8x32xf32>, vector<8x32xf32>, vector<8x32xf32> -> vector<64x32xf32>
    %c0_41 = arith.constant 0 : index
    %c0_42 = arith.constant 0 : index
    %336 = vector.load %arg4[%c0_41, %c0_42] : memref<32x128xf32, #tpu.memory_space<vmem>>, vector<32x128xf32>
    %cst_43 = arith.constant dense<0.000000e+00> : vector<64x128xf32>
    %337 = tpu.matmul %335, %336, %cst_43 {dimension_numbers = #tpu.dot_dimension_numbers<[1], [0], [0], [1], [0, 0, 1, 1], [], []>} : vector<64x32xf32>, vector<32x128xf32>, vector<64x128xf32> -> vector<64x128xf32>
    %c0_44 = arith.constant 0 : index
    %c0_45 = arith.constant 0 : index
    %338 = vector.load %arg5[%c0_44, %c0_45] : memref<1x128xf32, #tpu.memory_space<vmem>>, vector<1x128xf32>
    %339 = vector.broadcast %338 : vector<1x128xf32> to vector<64x128xf32>
    %340 = arith.addf %337, %339 : vector<64x128xf32>
    %c0_46 = arith.constant 0 : index
    %c0_47 = arith.constant 0 : index
    %341 = vector.load %arg7[%c0_46, %c0_47] : memref<64x128xf32, #tpu.memory_space<vmem>>, vector<64x128xf32>
    tpu.vector_store %arg7[%c0_46, %c0_47], %340 {strides = array<i32>} : memref<64x128xf32, #tpu.memory_space<vmem>>, vector<64x128xf32>,
    %c0_48 = arith.constant 0 : index
    %c0_49 = arith.constant 0 : index
    %c0_50 = arith.constant 0 : index
    %342 = vector.load %arg8[%c0_48, %c0_49, %c0_50] : memref<4x8x32xf32, #tpu.memory_space<vmem>>, vector<1x8x32xf32>
    %343 = vector.shape_cast %342 : vector<1x8x32xf32> to vector<8x32xf32>
    %344 = vector.shape_cast %297 : vector<8x32xf32> to vector<1x8x32xf32>
    tpu.vector_store %arg8[%c0_48, %c0_49, %c0_50], %344 {strides = array<i32>} : memref<4x8x32xf32, #tpu.memory_space<vmem>>, vector<1x8x32xf32>,
    %c2_51 = arith.constant 2 : index
    %c0_52 = arith.constant 0 : index
    %c0_53 = arith.constant 0 : index
    %345 = vector.load %arg8[%c2_51, %c0_52, %c0_53] : memref<4x8x32xf32, #tpu.memory_space<vmem>>, vector<1x8x32xf32>
    %346 = vector.shape_cast %345 : vector<1x8x32xf32> to vector<8x32xf32>
    %347 = vector.shape_cast %295 : vector<8x32xf32> to vector<1x8x32xf32>
    tpu.vector_store %arg8[%c2_51, %c0_52, %c0_53], %347 {strides = array<i32>} : memref<4x8x32xf32, #tpu.memory_space<vmem>>, vector<1x8x32xf32>,
    %c1_54 = arith.constant 1 : index
    %c0_55 = arith.constant 0 : index
    %c0_56 = arith.constant 0 : index
    %348 = vector.load %arg8[%c1_54, %c0_55, %c0_56] : memref<4x8x32xf32, #tpu.memory_space<vmem>>, vector<1x8x32xf32>
    %349 = vector.shape_cast %348 : vector<1x8x32xf32> to vector<8x32xf32>
    %350 = vector.shape_cast %334 : vector<8x32xf32> to vector<1x8x32xf32>
    tpu.vector_store %arg8[%c1_54, %c0_55, %c0_56], %350 {strides = array<i32>} : memref<4x8x32xf32, #tpu.memory_space<vmem>>, vector<1x8x32xf32>,
    %c3_57 = arith.constant 3 : index
    %c0_58 = arith.constant 0 : index
    %c0_59 = arith.constant 0 : index
    %351 = vector.load %arg8[%c3_57, %c0_58, %c0_59] : memref<4x8x32xf32, #tpu.memory_space<vmem>>, vector<1x8x32xf32>
    %352 = vector.shape_cast %351 : vector<1x8x32xf32> to vector<8x32xf32>
    %353 = vector.shape_cast %332 : vector<8x32xf32> to vector<1x8x32xf32>
    tpu.vector_store %arg8[%c3_57, %c0_58, %c0_59], %353 {strides = array<i32>} : memref<4x8x32xf32, #tpu.memory_space<vmem>>, vector<1x8x32xf32>,
    return
  }
}

</mosaic_0001>

<bundles_post_ra>
// kernel: text_generator_forward.1
= control target key start
LH: loop header
LB: loop body
LE: loop exit
PB: predicated region body
PF: predicated region fallthrough
CT: control target
= control target key end

     0   :  { %14 = vsyncpa [#allocation3], 0  ;;  %s2535_s0 = inlined_call_operand.vmem [shape: s32[64,1], index: 0, kind: input, shape index: {}]   ;;  %s2536_s1 = inlined_call_operand.vmem [shape: f32[128,128], index: 1, kind: input, shape index: {}]   ;;  %s2537_s2 = inlined_call_operand.hbm [shape: f32[64,256], index: 2, kind: input, shape index: {}]   ;;  %s2538_s3 = inlined_call_operand.vmem [shape: f32[1,256], index: 3, kind: input, shape index: {}]   ;;  %s2539_s4 = inlined_call_operand.hbm [shape: f32[32,128], index: 4, kind: input, shape index: {}]   ;;  %s2540_s5 = inlined_call_operand.vmem [shape: f32[1,128], index: 5, kind: input, shape index: {}]   ;;  %s2541_s6 = inlined_call_operand.vmem [shape: f32[4,8,32], index: 6, kind: input, shape index: {}]   ;;  %s2542_s7 = inlined_call_operand.vmem [shape: f32[64,128], index: 7, kind: output, shape index: {0}]   ;;  %s2543_s8 = inlined_call_operand.vmem [shape: f32[4,8,32], index: 8, kind: output, shape index: {1}]  }
   0x1   :  { %15 = vsyncpa [#allocation5], 0  ;;  %s1948_s27 = smov [#allocation2]  }
   0x2   :  { %s25_s28 = sshll.u32 %s1948_s27, 4  ;;  %s26_s28 = int_to_ptr.vmem [resolvable:$true] %s25_s28 }
   0x3   :  { %s1912_s29 = scalar_lea.vmem %s26_s28, 2048  ;;  %p1917_p1 = scmp.lt.s32.totalorder %s26_s28, %s26_s28 }
   0x4   :  { %p1913_p0 = scmp.ne.s32.totalorder %s26_s28, %s1912_s29  ;;  %p1918_p2 = scmp.lt.s32.totalorder %s1912_s29, %s1912_s29 }
   0x6   :  { %p1919_p3 = por %p1918_p2, %p1917_p1 }
   0x8   :  { %p1920_p4 = pnand %p1919_p3, %p1913_p0 }
   0xa   :  { %1923 = shalt.err (!%p1920_p4)
}
   0xb   :  { %s1949_s30 = smov 256   ;;  %s1950_s9 = smov 16  }
   0xc   :  { %31 = dma.hbm_to_vmem [thread:$0]  %s2537_s2, 2048, %s26_s28, [#allocation3], %s1949_s30, %s1949_s30, %s1950_s9  }
   0xd   :  { %s1951_s12 = smov [#allocation4]  }
   0xe   :  { %s39_s13 = sshll.u32 %s1951_s12, 4  ;;  %s40_s13 = int_to_ptr.vmem [resolvable:$true] %s39_s13 }
   0xf   :  { %s1932_s14 = scalar_lea.vmem %s40_s13, 512  ;;  %p1937_p6 = scmp.lt.s32.totalorder %s40_s13, %s40_s13 }
  0x10   :  { %p1933_p5 = scmp.ne.s32.totalorder %s40_s13, %s1932_s14  ;;  %p1938_p7 = scmp.lt.s32.totalorder %s1932_s14, %s1932_s14 }
  0x12   :  { %p1939_p8 = por %p1938_p7, %p1937_p6 }
  0x14   :  { %p1940_p9 = pnand %p1939_p8, %p1933_p5 }
  0x16   :  { %1943 = shalt.err (!%p1940_p9)
}
  0x17   :  { %s1952_s15 = smov 128   ;;  %s1953_s16 = smov 8  }
  0x18   :  { %45 = dma.hbm_to_vmem [thread:$0]  %s2539_s4, 512, %s40_s13, [#allocation5], %s1952_s15, %s1952_s15, %s1953_s16  }
  0x19   :  { %1944 = dma.done.wait [#allocation3], 2048  }
  0x1a   :  { %1945 = vsyncadd [#allocation3], 4294965248 }
  0x1b   :  { %1946 = dma.done.wait [#allocation5], 512  }
  0x1c   :  { %1947 = vsyncadd [#allocation5], 4294966784  ;;  %v1954_v0 = vmov 0   ;;  %v1955_v1 = vmov 0.0   ;;  %v56_v2 = vld [vmem:[%s2535_s0] sm:$0xff]  ;;  %v1608_v3 = vld [vmem:[%s2541_s6 + $0x8] sm:$0xff]  ;;  %v64_v41 = vlaneseq }
  0x1d   :  { %1760 = vset.pattern.permute.xlu0 %v1954_v0  ;;  %1761 = vset.pattern.permute.xlu1 %v1954_v0  ;;  %s1956_s4 = smov 32   ;;  %v129_v4 = vld [vmem:[%s2536_s1 + $0x78] sm:$0xff]  ;;  %v128_v5 = vld [vmem:[%s2536_s1 + $0x70] sm:$0xff]  ;;  %v57_v6 = vld [vmem:[%s2535_s0 + $0x8] sm:$0xff]  ;;  %vm274_vm0 = vcmask 261120   ;;  %vm276_vm1 = vcmask 523264  }
  0x1e   :  { %344 = vmatprep.mubr.f32.mxu1 %v1955_v1  ;;  %67 = vperm.xlu0 %1760, %v56_v2   ;;  %v127_v7 = vld [vmem:[%s2536_s1 + $0x68] sm:$0xff]  ;;  %v2031_v8 = vld [vmem:[#allocation2 + $0x78] sm:$0xff]  ;;  %v2034_v9 = vld [vmem:[#allocation2 + $0x70] sm:$0xff]  ;;  %v2136_v42 = vand.u32 127, %v64_v41  ;;  %v1957_v44 = vmov 1.0   ;;  %v254_v46 = vshrl.u32 %v64_v41, 7 }
  0x1f   :  { %271 = vrot.lane.b32.xlu1 %v1608_v3, %s1956_s4  ;;  %1684 = vmatprep.subr.mxu0 %v129_v4  ;;  %v2036_v10 = vld [vmem:[#allocation2 + $0x68] sm:$0xff]  ;;  %v126_v11 = vld [vmem:[%s2536_s1 + $0x60] sm:$0xff]  ;;  %v2044_v13 = vld [vmem:[#allocation2 + $0x58] sm:$0xff]  ;;  %s1959_s28 = smov 96  }
  0x20   :  { %1685 = vmatpush3.msra.mxu0 %v129_v4  ;;  %296 = vmatprep.subr.mxu1 %v2031_v8  ;;  %v2041_v12 = vld [vmem:[#allocation2 + $0x60] sm:$0xff]  ;;  %v125_v14 = vld [vmem:[%s2536_s1 + $0x58] sm:$0xff]  ;;  %v2050_v15 = vld [vmem:[#allocation2 + $0x50] sm:$0xff]  ;;  %v255_v49 = vsub.s32 0, %v254_v46 }
  0x21   :  { %1686 = vmatprep.subr.mxu0 %v128_v5  ;;  %297 = vmatpush1.msra.mxu1 %v2034_v9  ;;  %v2053_v16 = vld [vmem:[#allocation2 + $0x48] sm:$0xff]  ;;  %v124_v17 = vld [vmem:[%s2536_s1 + $0x50] sm:$0xff]  ;;  %v2059_v18 = vld [vmem:[#allocation2 + $0x40] sm:$0xff] }
  0x22   :  { %70 = vperm.xlu0 %1760, %v57_v6   ;;  %1687 = vmatpush3.msra.mxu0 %v128_v5  ;;  %v2062_v19 = vld [vmem:[#allocation2 + $0x38] sm:$0xff]  ;;  %v123_v20 = vld [vmem:[%s2536_s1 + $0x48] sm:$0xff]  ;;  %v2068_v21 = vld [vmem:[#allocation2 + $0x30] sm:$0xff] }
  0x23   :  { %1688 = vmatprep.subr.mxu0 %v127_v7  ;;  %298 = vmatprep.subr.mxu1 %v2036_v10  ;;  %v2071_v22 = vld [vmem:[#allocation2 + $0x28] sm:$0xff]  ;;  %v122_v23 = vld [vmem:[%s2536_s1 + $0x40] sm:$0xff]  ;;  %v2080_v25 = vld [vmem:[#allocation2 + $0x18] sm:$0xff] }
  0x24   :  { %1689 = vmatpush3.msra.mxu0 %v127_v7  ;;  %299 = vmatpush1.msra.mxu1 %v2041_v12  ;;  %v2077_v24 = vld [vmem:[#allocation2 + $0x20] sm:$0xff]  ;;  %v121_v26 = vld [vmem:[%s2536_s1 + $0x38] sm:$0xff]  ;;  %v2086_v27 = vld [vmem:[#allocation2 + $0x10] sm:$0xff] }
  0x25   :  { %1690 = vmatprep.subr.mxu0 %v126_v11  ;;  %300 = vmatprep.subr.mxu1 %v2044_v13  ;;  %v2089_v28 = vld [vmem:[#allocation2 + $0x8] sm:$0xff]  ;;  %v120_v29 = vld [vmem:[%s2536_s1 + $0x30] sm:$0xff]  ;;  %v2095_v30 = vld [vmem:[#allocation2] sm:$0xff] }
  0x26   :  { %1691 = vmatpush3.msra.mxu0 %v126_v11  ;;  %301 = vmatpush1.msra.mxu1 %v2050_v15  ;;  %v1609_v31 = vld [vmem:[%s2541_s6 + $0x10] sm:$0xff]  ;;  %v119_v32 = vld [vmem:[%s2536_s1 + $0x28] sm:$0xff]  ;;  %v118_v33 = vld [vmem:[%s2536_s1 + $0x20] sm:$0xff] }
  0x27   :  { %1692 = vmatprep.subr.mxu0 %v125_v14  ;;  %302 = vmatprep.subr.mxu1 %v2053_v16  ;;  %v117_v34 = vld [vmem:[%s2536_s1 + $0x18] sm:$0xff]  ;;  %v116_v35 = vld [vmem:[%s2536_s1 + $0x10] sm:$0xff]  ;;  %v115_v36 = vld [vmem:[%s2536_s1 + $0x8] sm:$0xff] }
  0x28   :  { %1693 = vmatpush3.msra.mxu0 %v125_v14  ;;  %303 = vmatpush1.msra.mxu1 %v2059_v18  ;;  %v114_v37 = vld [vmem:[%s2536_s1] sm:$0xff]  ;;  %v259_v14 = vsub.s32 1, %v254_v46 }
  0x29   :  { %1694 = vmatprep.subr.mxu0 %v124_v17  ;;  %304 = vmatprep.subr.mxu1 %v2062_v19  ;;  %v263_v38 = vld [vmem:[%s2541_s6] sm:$0xff] }
  0x2a   :  { %1695 = vmatpush3.msra.mxu0 %v124_v17  ;;  %305 = vmatpush1.msra.mxu1 %v2068_v21  ;;  %v251_v50 = vld [vmem:[%s2538_s3] sm:$0x3]  ;;  %s1958_s3 = smov 64  }
  0x2b   :  { %1696 = vmatprep.subr.mxu0 %v123_v20  ;;  %306 = vmatprep.subr.mxu1 %v2071_v22  ;;  %v2174_v51 = vrot.slane %v251_v50, %v255_v49  ;;  %v2201_v17 = vrot.slane %v251_v50, %v259_v14 }
  0x2c   :  { %1697 = vmatpush3.msra.mxu0 %v123_v20  ;;  %307 = vmatpush1.msra.mxu1 %v2077_v24 }
  0x2d   :  { %1698 = vmatprep.subr.mxu0 %v122_v23  ;;  %308 = vmatprep.subr.mxu1 %v2080_v25 }
  0x2e   :  { %1699 = vmatpush3.msra.mxu0 %v122_v23  ;;  %309 = vmatpush1.msra.mxu1 %v2086_v27 }
  0x2f   :  { %1700 = vmatprep.subr.mxu0 %v121_v26  ;;  %310 = vmatprep.subr.mxu1 %v2089_v28 }
  0x30   :  { %1701 = vmatpush3.msra.mxu0 %v121_v26  ;;  %311 = vmatpush1.msra.mxu1 %v2095_v30 }
  0x31   :  { %1702 = vmatprep.subr.mxu0 %v120_v29  ;;  %359 = vrot.lane.b32.xlu0 %v1609_v31, %s1956_s4 }
  0x32   :  { %1703 = vmatpush3.msra.mxu0 %v120_v29  ;;  %403 = vmatprep.subr.mxu1 %v2031_v8 }
  0x33   :  { %1704 = vmatprep.subr.mxu0 %v119_v32 }
  0x34   :  { %1705 = vmatpush3.msra.mxu0 %v119_v32 }
  0x35   :  { %1706 = vmatprep.subr.mxu0 %v118_v33 }
  0x36   :  { %1707 = vmatpush3.msra.mxu0 %v118_v33 }
  0x37   :  { %1708 = vmatprep.subr.mxu0 %v117_v34 }
  0x38   :  { %1709 = vmatpush3.msra.mxu0 %v117_v34  ;;  %v1610_v34 = vld [vmem:[%s2541_s6 + $0x18] sm:$0xff] }
  0x39   :  { %1710 = vmatprep.subr.mxu0 %v116_v35 }
  0x3a   :  { %1711 = vmatpush3.msra.mxu0 %v116_v35 }
  0x3b   :  { %1712 = vmatprep.subr.mxu0 %v115_v36 }
  0x3c   :  { %1713 = vmatpush3.msra.mxu0 %v115_v36 }
  0x3d   :  { %1714 = vmatprep.subr.mxu0 %v114_v37 }
  0x3e   :  { %1715 = vmatpush3.msra.mxu0 %v114_v37 }
  0x3f   :  { %539 = vmatprep.subr.mxu0 %v2031_v8 }
  0x91   :  { %v2127_v39 = vpop.permute.xlu1 %271 }
  0x92   :  { %v275_v40 = vsel %vm274_vm0, %v263_v38, %v2127_v39 }
  0x93   :  { %1611 = vmatmul.mubr.msk.f32.vlgmr.msra.gmra.mxu1 %vm276_vm1, %v275_v40 }
  0x94   :  { %404 = vmatpush1.msra.mxu1 %v2034_v9  ;;  %451 = vmatprep.mubr.f32.mxu1 %v1955_v1 }
  0x95   :  { %405 = vmatprep.subr.mxu1 %v2036_v10 }
  0x96   :  { %406 = vmatpush1.msra.mxu1 %v2041_v12 }
  0x97   :  { %407 = vmatprep.subr.mxu1 %v2044_v13 }
  0x98   :  { %408 = vmatpush1.msra.mxu1 %v2050_v15 }
  0x99   :  { %409 = vmatprep.subr.mxu1 %v2053_v16  ;;  %v68_v43 = vpop.permute.xlu0 %67 }
  0x9a   :  { %410 = vmatpush1.msra.mxu1 %v2059_v18  ;;  %vm90_vm2 = vcmp.eq.s32.totalorder %v2136_v42, %v68_v43 }
  0x9b   :  { %411 = vmatprep.subr.mxu1 %v2062_v19  ;;  %1716 = vmatprep.mubr.msk.f32.mxu0 %vm90_vm2, %v1957_v44 }
  0x9c   :  { %412 = vmatpush1.msra.mxu1 %v2068_v21 }
  0x9d   :  { %413 = vmatprep.subr.mxu1 %v2071_v22  ;;  %v71_v45 = vpop.permute.xlu0 %70 }
  0x9e   :  { %414 = vmatpush1.msra.mxu1 %v2077_v24  ;;  %vm91_vm3 = vcmp.eq.s32.totalorder %v2136_v42, %v71_v45 }
  0x9f   :  { %415 = vmatprep.subr.mxu1 %v2080_v25  ;;  %1717 = vmatmul.mubr.msk.f32.vlgmr.msra.gmra.mxu0 %vm91_vm3, %v1957_v44 }
  0xa0   :  { %416 = vmatpush1.msra.mxu1 %v2086_v27  ;;  %540 = vmatpush1.msra.mxu0 %v2034_v9 }
  0xa1   :  { %417 = vmatprep.subr.mxu1 %v2089_v28  ;;  %541 = vmatprep.subr.mxu0 %v2036_v10 }
  0xa2   :  { %418 = vmatpush1.msra.mxu1 %v2095_v30  ;;  %542 = vmatpush1.msra.mxu0 %v2041_v12 }
  0xa3   :  { %671 = vmatprep.subr.mxu1 %v2031_v8  ;;  %543 = vmatprep.subr.mxu0 %v2044_v13  ;;  %v360_v63 = vpop.permute.xlu0 %359 }
  0xa4   :  { %544 = vmatpush1.msra.mxu0 %v2050_v15 }
  0xa5   :  { %545 = vmatprep.subr.mxu0 %v2053_v16 }
  0xa6   :  { %546 = vmatpush1.msra.mxu0 %v2059_v18 }
  0xa7   :  { %547 = vmatprep.subr.mxu0 %v2062_v19 }
  0xa8   :  { %548 = vmatpush1.msra.mxu0 %v2068_v21 }
  0xa9   :  { %549 = vmatprep.subr.mxu0 %v2071_v22 }
  0xaa   :  { %550 = vmatpush1.msra.mxu0 %v2077_v24 }
  0xab   :  { %551 = vmatprep.subr.mxu0 %v2080_v25 }
  0xac   :  { %552 = vmatpush1.msra.mxu0 %v2086_v27 }
  0xad   :  { %553 = vmatprep.subr.mxu0 %v2089_v28 }
  0xae   :  { %554 = vmatpush1.msra.mxu0 %v2095_v30 }
  0xaf   :  { %803 = vmatprep.subr.mxu0 %v2031_v8 }
 0x153   :  { %v346_v47 = vpop.f32.mrf.mxu1 }
 0x154   :  { %v347_v52 = vadd.f32 %v346_v47, %v2174_v51 }
 0x155   :  { %v348_v48 = vpop.f32.mrf.mxu1 }
 0x15f   :  { %v1718_v53 = vpop.f32.mrf.mxu0 }
 0x161   :  { %v196_v54 = vpop.f32.mrf.mxu0 }
 0x162   :  { %v350_v55 = vadd.f32 %v347_v52, %v196_v54 }
 0x164   :  { %1762 = vtanh.f32 %v350_v55  ;;  %v1612_v57 = vmul.f32 -1.442695, %v350_v55 }
 0x166   :  { %1764 = vpow2.f32 %v1612_v57 }
 0x171   :  { %v1763_v56 = vpop.eup %1762 }
 0x172   :  { %364 = vrot.lane.b32.xlu1 %v1763_v56, %s1956_s4 }
 0x173   :  { %v1765_v58 = vpop.eup %1764 }
 0x174   :  { %v354_v59 = vadd.f32 1.0, %v1765_v58 }
 0x176   :  { %1766 = vrcp.f32 %v354_v59  ;;  %v58_v59 = vld [vmem:[%s2535_s0 + $0x10] sm:$0xff] }
 0x183   :  { %v1767_v60 = vpop.eup %1766 }
 0x184   :  { %v362_v0 = vmul.f32 %v1767_v60, %v360_v63  ;;  %v62_v63 = vld [vmem:[%s2535_s0 + $0x30] sm:$0xff] }
 0x1e4   :  { %v365_v61 = vpop.permute.xlu1 %364 }
 0x1e5   :  { %v367_v62 = vmul.f32 %v1767_v60, %v365_v61  ;;  %v60_v61 = vld [vmem:[%s2535_s0 + $0x20] sm:$0xff] }
 0x1e7   :  { %369 = vrot.lane.b32.xlu1 %v367_v62, %s1956_s4  ;;  %v61_v62 = vld [vmem:[%s2535_s0 + $0x28] sm:$0xff] }
 0x259   :  { %v370_v2 = vpop.permute.xlu1 %369 }
 0x25a   :  { %v372_v3 = vadd.f32 %v370_v2, %v362_v0  ;;  %v63_v0 = vld [vmem:[%s2535_s0 + $0x38] sm:$0xff] }
 0x25c   :  { %1768 = vtanh.f32 %v372_v3 }
 0x269   :  { %v1769_v4 = vpop.eup %1768 }
 0x26a   :  { %375 = vrot.lane.b32.xlu0 %v1769_v4, %s1956_s4 }
 0x2dc   :  { %v376_v5 = vpop.permute.xlu0 %375 }
 0x2dd   :  { %v378_v6 = vmul.f32 %v1767_v60, %v376_v5  ;;  %v59_v60 = vld [vmem:[%s2535_s0 + $0x18] sm:$0xff] }
 0x2df   :  { %380 = vrot.lane.b32.xlu1 %v378_v6, %s1958_s3 }
 0x351   :  { %v381_v7 = vpop.permute.xlu1 %380 }
 0x352   :  { %v383_v11 = vsel %vm274_vm0, %v381_v7, %v2127_v39 }
 0x353   :  { %1613 = vmatmul.mubr.msk.f32.vlgmr.msra.gmra.mxu1 %vm276_vm1, %v383_v11 }
 0x354   :  { %672 = vmatpush1.msra.mxu1 %v2034_v9  ;;  %719 = vmatprep.mubr.f32.mxu1 %v1955_v1 }
 0x355   :  { %673 = vmatprep.subr.mxu1 %v2036_v10 }
 0x356   :  { %674 = vmatpush1.msra.mxu1 %v2041_v12 }
 0x357   :  { %675 = vmatprep.subr.mxu1 %v2044_v13 }
 0x358   :  { %676 = vmatpush1.msra.mxu1 %v2050_v15 }
 0x359   :  { %677 = vmatprep.subr.mxu1 %v2053_v16 }
 0x35a   :  { %678 = vmatpush1.msra.mxu1 %v2059_v18 }
 0x35b   :  { %679 = vmatprep.subr.mxu1 %v2062_v19 }
 0x35c   :  { %680 = vmatpush1.msra.mxu1 %v2068_v21 }
 0x35d   :  { %681 = vmatprep.subr.mxu1 %v2071_v22 }
 0x35e   :  { %682 = vmatpush1.msra.mxu1 %v2077_v24 }
 0x35f   :  { %683 = vmatprep.subr.mxu1 %v2080_v25 }
 0x360   :  { %684 = vmatpush1.msra.mxu1 %v2086_v27 }
 0x361   :  { %685 = vmatprep.subr.mxu1 %v2089_v28 }
 0x362   :  { %686 = vmatpush1.msra.mxu1 %v2095_v30 }
 0x363   :  { %935 = vmatprep.subr.mxu1 %v2031_v8 }
 0x413   :  { %v453_v20 = vpop.f32.mrf.mxu1 }
 0x414   :  { %v454_v23 = vadd.f32 %v453_v20, %v2174_v51 }
 0x415   :  { %v455_v26 = vpop.f32.mrf.mxu1 }
 0x416   :  { %v458_v29 = vadd.f32 %v1718_v53, %v454_v23  ;;  %v456_v31 = vadd.f32 %v455_v26, %v2201_v17 }
 0x418   :  { %1770 = vtanh.f32 %v458_v29  ;;  %v1614_v35 = vmul.f32 -1.442695, %v458_v29  ;;  %v1615_v36 = vmul.f32 -1.442695, %v456_v31 }
 0x419   :  { %1772 = vtanh.f32 %v456_v31 }
 0x41a   :  { %1774 = vpow2.f32 %v1614_v35 }
 0x41b   :  { %1776 = vpow2.f32 %v1615_v36 }
 0x425   :  { %v1771_v32 = vpop.eup %1770 }
 0x426   :  { %v1773_v33 = vpop.eup %1772  ;;  %468 = vrot.lane.b32.xlu0 %v1771_v32, %s1956_s4 }
 0x427   :  { %496 = vrot.lane.b32.xlu1 %v1773_v33, %s1956_s4  ;;  %v1775_v37 = vpop.eup %1774 }
 0x428   :  { %v1777_v38 = vpop.eup %1776  ;;  %v462_v39 = vadd.f32 1.0, %v1775_v37 }
 0x429   :  { %v486_v40 = vadd.f32 1.0, %v1777_v38 }
 0x42a   :  { %491 = vrot.lane.b32.xlu0 %v1610_v34, %s1956_s4  ;;  %1778 = vrcp.f32 %v462_v39 }
 0x42b   :  { %1780 = vrcp.f32 %v486_v40 }
 0x437   :  { %v1779_v41 = vpop.eup %1778 }
 0x438   :  { %v1781_v45 = vpop.eup %1780  ;;  %v466_v50 = vmul.f32 %v1779_v41, %v372_v3 }
 0x498   :  { %v469_v43 = vpop.permute.xlu0 %468 }
 0x499   :  { %v497_v46 = vpop.permute.xlu1 %496  ;;  %v471_v47 = vmul.f32 %v1779_v41, %v469_v43 }
 0x49a   :  { %v499_v48 = vmul.f32 %v1781_v45, %v497_v46 }
 0x49b   :  { %473 = vrot.lane.b32.xlu1 %v471_v47, %s1956_s4 }
 0x49c   :  { %501 = vrot.lane.b32.xlu0 %v499_v48, %s1956_s4  ;;  %v492_v49 = vpop.permute.xlu0 %491 }
 0x49d   :  { %v494_v52 = vmul.f32 %v1781_v45, %v492_v49 }
 0x50d   :  { %v474_v53 = vpop.permute.xlu1 %473 }
 0x50e   :  { %v502_v54 = vpop.permute.xlu0 %501  ;;  %v2213_v55 = vadd.f32 %v474_v53, %v466_v50 }
 0x50f   :  { %v2215_v56 = vadd.f32 %v502_v54, %v494_v52 }
 0x510   :  { %1782 = vtanh.f32 %v2213_v55 }
 0x511   :  { %1784 = vtanh.f32 %v2215_v56 }
 0x51d   :  { %v1783_v57 = vpop.eup %1782 }
 0x51e   :  { %v1785_v58 = vpop.eup %1784  ;;  %479 = vrot.lane.b32.xlu1 %v1783_v57, %s1956_s4 }
 0x51f   :  { %507 = vrot.lane.b32.xlu0 %v1785_v58, %s1956_s4 }
 0x522   :  { %73 = vperm.xlu1 %1761, %v58_v59  }
 0x523   :  { %76 = vperm.xlu0 %1760, %v59_v60  }
 0x526   :  { %79 = vperm.xlu1 %1761, %v60_v61  }
 0x527   :  { %82 = vperm.xlu0 %1760, %v61_v62  }
 0x52a   :  { %85 = vperm.xlu1 %1761, %v62_v63  }
 0x52b   :  { %88 = vperm.xlu0 %1760, %v63_v0  }
 0x590   :  { %v480_v2 = vpop.permute.xlu1 %479 }
 0x591   :  { %v508_v3 = vpop.permute.xlu0 %507  ;;  %v482_v4 = vmul.f32 %v1779_v41, %v480_v2 }
 0x592   :  { %v2239_v5 = vmul.f32 %v1781_v45, %v508_v3 }
 0x593   :  { %512 = vrot.lane.b32.xlu1 %v482_v4, %s1958_s3 }
 0x594   :  { %516 = vrot.lane.b32.xlu0 %v2239_v5, %s1959_s28 }
 0x59d   :  { %v74_v6 = vpop.permute.xlu1 %73 }
 0x59e   :  { %v77_v7 = vpop.permute.xlu0 %76  ;;  %vm92_vm4 = vcmp.eq.s32.totalorder %v2136_v42, %v74_v6 }
 0x59f   :  { %vm93_vm5 = vcmp.eq.s32.totalorder %v2136_v42, %v77_v7  ;;  %1719 = vmatprep.mubr.msk.f32.mxu0 %vm92_vm4, %v1957_v44 }
 0x5a0   :  { %1720 = vmatmul.mubr.msk.f32.gmra.mxu0 %vm93_vm5, %v1957_v44 }
 0x5a1   :  { %v80_v11 = vpop.permute.xlu1 %79 }
 0x5a2   :  { %v83_v14 = vpop.permute.xlu0 %82  ;;  %vm94_vm6 = vcmp.eq.s32.totalorder %v2136_v42, %v80_v11 }
 0x5a3   :  { %vm95_vm7 = vcmp.eq.s32.totalorder %v2136_v42, %v83_v14  ;;  %1722 = vmatprep.mubr.msk.f32.mxu0 %vm94_vm6, %v1957_v44 }
 0x5a4   :  { %1723 = vmatmul.mubr.msk.f32.gmra.mxu0 %vm95_vm7, %v1957_v44 }
 0x5a5   :  { %v86_v20 = vpop.permute.xlu1 %85 }
 0x5a6   :  { %v89_v23 = vpop.permute.xlu0 %88  ;;  %vm96_vm8 = vcmp.eq.s32.totalorder %v2136_v42, %v86_v20 }
 0x5a7   :  { %vm97_vm9 = vcmp.eq.s32.totalorder %v2136_v42, %v89_v23  ;;  %1725 = vmatprep.mubr.msk.f32.mxu0 %vm96_vm8, %v1957_v44 }
 0x5a8   :  { %1726 = vmatmul.mubr.msk.f32.gmra.mxu0 %vm97_vm9, %v1957_v44 }
 0x5a9   :  { %587 = vmatprep.mubr.f32.mxu0 %v1955_v1 }
 0x605   :  { %v513_v26 = vpop.permute.xlu1 %512 }
 0x606   :  { %v517_v29 = vpop.permute.xlu0 %516 }
 0x607   :  { %v519_v31 = vsel %vm274_vm0, %v513_v26, %v517_v29 }
 0x608   :  { %1616 = vmatmul.mubr.msk.f32.vlgmr.msra.gmra.mxu0 %vm276_vm1, %v519_v31 }
 0x609   :  { %804 = vmatpush1.msra.mxu0 %v2034_v9  ;;  %851 = vmatprep.mubr.f32.mxu0 %v1955_v1 }
 0x60a   :  { %805 = vmatprep.subr.mxu0 %v2036_v10 }
 0x60b   :  { %806 = vmatpush1.msra.mxu0 %v2041_v12 }
 0x60c   :  { %807 = vmatprep.subr.mxu0 %v2044_v13 }
 0x60d   :  { %808 = vmatpush1.msra.mxu0 %v2050_v15 }
 0x60e   :  { %809 = vmatprep.subr.mxu0 %v2053_v16 }
 0x60f   :  { %810 = vmatpush1.msra.mxu0 %v2059_v18 }
 0x610   :  { %811 = vmatprep.subr.mxu0 %v2062_v19 }
 0x611   :  { %812 = vmatpush1.msra.mxu0 %v2068_v21 }
 0x612   :  { %813 = vmatprep.subr.mxu0 %v2071_v22 }
 0x613   :  { %814 = vmatpush1.msra.mxu0 %v2077_v24 }
 0x614   :  { %815 = vmatprep.subr.mxu0 %v2080_v25 }
 0x615   :  { %816 = vmatpush1.msra.mxu0 %v2086_v27 }
 0x616   :  { %817 = vmatprep.subr.mxu0 %v2089_v28 }
 0x617   :  { %818 = vmatpush1.msra.mxu0 %v2095_v30 }
 0x618   :  { %1067 = vmatprep.subr.mxu0 %v2031_v8 }
 0x660   :  { %v2276_v42 = vpop.f32.mrf.mxu0 }
 0x662   :  { %v206_v44 = vpop.f32.mrf.mxu0 }
 0x664   :  { %v2278_v32 = vpop.f32.mrf.mxu0 }
 0x666   :  { %v2280_v33 = vpop.f32.mrf.mxu0 }
 0x668   :  { %v2282_v34 = vpop.f32.mrf.mxu0 }
 0x66a   :  { %v2284_v35 = vpop.f32.mrf.mxu0 }
 0x6c8   :  { %v589_v36 = vpop.f32.mrf.mxu0 }
 0x6c9   :  { %v590_v37 = vadd.f32 %v589_v36, %v2174_v51 }
 0x6ca   :  { %v591_v38 = vpop.f32.mrf.mxu0 }
 0x6cb   :  { %v594_v39 = vadd.f32 %v590_v37, %v206_v44  ;;  %v592_v40 = vadd.f32 %v591_v38, %v2201_v17 }
 0x6cd   :  { %1786 = vtanh.f32 %v594_v39  ;;  %v1617_v45 = vmul.f32 -1.442695, %v594_v39  ;;  %v1618_v46 = vmul.f32 -1.442695, %v592_v40 }
 0x6ce   :  { %1788 = vtanh.f32 %v592_v40 }
 0x6cf   :  { %1790 = vpow2.f32 %v1617_v45 }
 0x6d0   :  { %1792 = vpow2.f32 %v1618_v46 }
 0x6da   :  { %v1787_v41 = vpop.eup %1786 }
 0x6db   :  { %v1789_v43 = vpop.eup %1788  ;;  %604 = vrot.lane.b32.xlu1 %v1787_v41, %s1956_s4 }
 0x6dc   :  { %628 = vrot.lane.b32.xlu0 %v1789_v43, %s1956_s4  ;;  %v1791_v47 = vpop.eup %1790 }
 0x6dd   :  { %v1793_v48 = vpop.eup %1792  ;;  %v598_v49 = vadd.f32 1.0, %v1791_v47 }
 0x6de   :  { %v622_v50 = vadd.f32 1.0, %v1793_v48 }
 0x6df   :  { %1794 = vrcp.f32 %v598_v49 }
 0x6e0   :  { %1796 = vrcp.f32 %v622_v50 }
 0x6ec   :  { %v1795_v52 = vpop.eup %1794 }
 0x6ed   :  { %v1797_v54 = vpop.eup %1796  ;;  %v602_v60 = vmul.f32 %v1795_v52, %v2213_v55 }
 0x6ee   :  { %v626_v61 = vmul.f32 %v1797_v54, %v2215_v56 }
 0x74d   :  { %v605_v53 = vpop.permute.xlu1 %604 }
 0x74e   :  { %v629_v57 = vpop.permute.xlu0 %628  ;;  %v607_v58 = vmul.f32 %v1795_v52, %v605_v53 }
 0x74f   :  { %v631_v59 = vmul.f32 %v1797_v54, %v629_v57 }
 0x750   :  { %609 = vrot.lane.b32.xlu1 %v607_v58, %s1956_s4 }
 0x751   :  { %633 = vrot.lane.b32.xlu0 %v631_v59, %s1956_s4 }
 0x7c2   :  { %v610_v62 = vpop.permute.xlu1 %609 }
 0x7c3   :  { %v634_v63 = vpop.permute.xlu0 %633  ;;  %v2294_v0 = vadd.f32 %v610_v62, %v602_v60 }
 0x7c4   :  { %v2296_v2 = vadd.f32 %v634_v63, %v626_v61 }
 0x7c5   :  { %1798 = vtanh.f32 %v2294_v0 }
 0x7c6   :  { %1800 = vtanh.f32 %v2296_v2 }
 0x7d2   :  { %v1799_v3 = vpop.eup %1798 }
 0x7d3   :  { %v1801_v4 = vpop.eup %1800  ;;  %615 = vrot.lane.b32.xlu1 %v1799_v3, %s1956_s4 }
 0x7d4   :  { %639 = vrot.lane.b32.xlu0 %v1801_v4, %s1956_s4 }
 0x845   :  { %v616_v6 = vpop.permute.xlu1 %615 }
 0x846   :  { %v640_v55 = vpop.permute.xlu0 %639  ;;  %v618_v7 = vmul.f32 %v1795_v52, %v616_v6 }
 0x847   :  { %v2302_v56 = vmul.f32 %v1797_v54, %v640_v55 }
 0x848   :  { %644 = vrot.lane.b32.xlu1 %v618_v7, %s1958_s3 }
 0x849   :  { %648 = vrot.lane.b32.xlu0 %v2302_v56, %s1959_s28 }
 0x8ba   :  { %v645_v11 = vpop.permute.xlu1 %644 }
 0x8bb   :  { %v649_v14 = vpop.permute.xlu0 %648 }
 0x8bc   :  { %v651_v20 = vsel %vm274_vm0, %v645_v11, %v649_v14 }
 0x8bd   :  { %1619 = vmatmul.mubr.msk.f32.vlgmr.msra.gmra.mxu1 %vm276_vm1, %v651_v20 }
 0x8be   :  { %936 = vmatpush1.msra.mxu1 %v2034_v9  ;;  %983 = vmatprep.mubr.f32.mxu1 %v1955_v1 }
 0x8bf   :  { %937 = vmatprep.subr.mxu1 %v2036_v10 }
 0x8c0   :  { %938 = vmatpush1.msra.mxu1 %v2041_v12 }
 0x8c1   :  { %939 = vmatprep.subr.mxu1 %v2044_v13 }
 0x8c2   :  { %940 = vmatpush1.msra.mxu1 %v2050_v15 }
 0x8c3   :  { %941 = vmatprep.subr.mxu1 %v2053_v16 }
 0x8c4   :  { %942 = vmatpush1.msra.mxu1 %v2059_v18 }
 0x8c5   :  { %943 = vmatprep.subr.mxu1 %v2062_v19 }
 0x8c6   :  { %944 = vmatpush1.msra.mxu1 %v2068_v21 }
 0x8c7   :  { %945 = vmatprep.subr.mxu1 %v2071_v22 }
 0x8c8   :  { %946 = vmatpush1.msra.mxu1 %v2077_v24 }
 0x8c9   :  { %947 = vmatprep.subr.mxu1 %v2080_v25 }
 0x8ca   :  { %948 = vmatpush1.msra.mxu1 %v2086_v27 }
 0x8cb   :  { %949 = vmatprep.subr.mxu1 %v2089_v28 }
 0x8cc   :  { %950 = vmatpush1.msra.mxu1 %v2095_v30 }
 0x8cd   :  { %1199 = vmatprep.subr.mxu1 %v2031_v8 }
 0x97d   :  { %v721_v23 = vpop.f32.mrf.mxu1 }
 0x97e   :  { %v722_v26 = vadd.f32 %v721_v23, %v2174_v51 }
 0x97f   :  { %v723_v29 = vpop.f32.mrf.mxu1 }
 0x980   :  { %v726_v31 = vadd.f32 %v2276_v42, %v722_v26  ;;  %v724_v44 = vadd.f32 %v723_v29, %v2201_v17 }
 0x982   :  { %1802 = vtanh.f32 %v726_v31  ;;  %v1620_v38 = vmul.f32 -1.442695, %v726_v31  ;;  %v1621_v39 = vmul.f32 -1.442695, %v724_v44 }
 0x983   :  { %1804 = vtanh.f32 %v724_v44 }
 0x984   :  { %1806 = vpow2.f32 %v1620_v38 }
 0x985   :  { %1808 = vpow2.f32 %v1621_v39 }
 0x98f   :  { %v1803_v36 = vpop.eup %1802 }
 0x990   :  { %v1805_v37 = vpop.eup %1804  ;;  %736 = vrot.lane.b32.xlu1 %v1803_v36, %s1956_s4 }
 0x991   :  { %760 = vrot.lane.b32.xlu0 %v1805_v37, %s1956_s4  ;;  %v1807_v40 = vpop.eup %1806 }
 0x992   :  { %v1809_v41 = vpop.eup %1808  ;;  %v730_v43 = vadd.f32 1.0, %v1807_v40 }
 0x993   :  { %v754_v45 = vadd.f32 1.0, %v1809_v41 }
 0x994   :  { %1810 = vrcp.f32 %v730_v43 }
 0x995   :  { %1812 = vrcp.f32 %v754_v45 }
 0x9a1   :  { %v1811_v42 = vpop.eup %1810 }
 0x9a2   :  { %v1813_v47 = vpop.eup %1812  ;;  %v734_v52 = vmul.f32 %v1811_v42, %v2294_v0 }
 0x9a3   :  { %v758_v53 = vmul.f32 %v1813_v47, %v2296_v2 }
 0xa02   :  { %v737_v46 = vpop.permute.xlu1 %736 }
 0xa03   :  { %v761_v48 = vpop.permute.xlu0 %760  ;;  %v739_v49 = vmul.f32 %v1811_v42, %v737_v46 }
 0xa04   :  { %v763_v50 = vmul.f32 %v1813_v47, %v761_v48 }
 0xa05   :  { %741 = vrot.lane.b32.xlu1 %v739_v49, %s1956_s4 }
 0xa06   :  { %765 = vrot.lane.b32.xlu0 %v763_v50, %s1956_s4 }
 0xa77   :  { %v742_v54 = vpop.permute.xlu1 %741 }
 0xa78   :  { %v766_v57 = vpop.permute.xlu0 %765  ;;  %v2335_v58 = vadd.f32 %v742_v54, %v734_v52 }
 0xa79   :  { %v2337_v59 = vadd.f32 %v766_v57, %v758_v53 }
 0xa7a   :  { %1814 = vtanh.f32 %v2335_v58 }
 0xa7b   :  { %1816 = vtanh.f32 %v2337_v59 }
 0xa87   :  { %v1815_v60 = vpop.eup %1814 }
 0xa88   :  { %v1817_v61 = vpop.eup %1816  ;;  %747 = vrot.lane.b32.xlu1 %v1815_v60, %s1956_s4 }
 0xa89   :  { %771 = vrot.lane.b32.xlu0 %v1817_v61, %s1956_s4 }
 0xafa   :  { %v748_v62 = vpop.permute.xlu1 %747 }
 0xafb   :  { %v772_v63 = vpop.permute.xlu0 %771  ;;  %v750_v0 = vmul.f32 %v1811_v42, %v748_v62 }
 0xafc   :  { %v2343_v2 = vmul.f32 %v1813_v47, %v772_v63 }
 0xafd   :  { %776 = vrot.lane.b32.xlu1 %v750_v0, %s1958_s3 }
 0xafe   :  { %780 = vrot.lane.b32.xlu0 %v2343_v2, %s1959_s28 }
 0xb6f   :  { %v777_v3 = vpop.permute.xlu1 %776 }
 0xb70   :  { %v781_v4 = vpop.permute.xlu0 %780 }
 0xb71   :  { %v783_v6 = vsel %vm274_vm0, %v777_v3, %v781_v4 }
 0xb72   :  { %1622 = vmatmul.mubr.msk.f32.vlgmr.msra.gmra.mxu0 %vm276_vm1, %v783_v6 }
 0xb73   :  { %1068 = vmatpush1.msra.mxu0 %v2034_v9  ;;  %1115 = vmatprep.mubr.f32.mxu0 %v1955_v1 }
 0xb74   :  { %1069 = vmatprep.subr.mxu0 %v2036_v10 }
 0xb75   :  { %1070 = vmatpush1.msra.mxu0 %v2041_v12 }
 0xb76   :  { %1071 = vmatprep.subr.mxu0 %v2044_v13 }
 0xb77   :  { %1072 = vmatpush1.msra.mxu0 %v2050_v15 }
 0xb78   :  { %1073 = vmatprep.subr.mxu0 %v2053_v16 }
 0xb79   :  { %1074 = vmatpush1.msra.mxu0 %v2059_v18 }
 0xb7a   :  { %1075 = vmatprep.subr.mxu0 %v2062_v19 }
 0xb7b   :  { %1076 = vmatpush1.msra.mxu0 %v2068_v21 }
 0xb7c   :  { %1077 = vmatprep.subr.mxu0 %v2071_v22 }
 0xb7d   :  { %1078 = vmatpush1.msra.mxu0 %v2077_v24 }
 0xb7e   :  { %1079 = vmatprep.subr.mxu0 %v2080_v25 }
 0xb7f   :  { %1080 = vmatpush1.msra.mxu0 %v2086_v27 }
 0xb80   :  { %1081 = vmatprep.subr.mxu0 %v2089_v28 }
 0xb81   :  { %1082 = vmatpush1.msra.mxu0 %v2095_v30 }
 0xb82   :  { %1331 = vmatprep.subr.mxu0 %v2031_v8 }
 0xc32   :  { %v853_v55 = vpop.f32.mrf.mxu0 }
 0xc33   :  { %v854_v7 = vadd.f32 %v853_v55, %v2174_v51 }
 0xc34   :  { %v855_v11 = vpop.f32.mrf.mxu0 }
 0xc35   :  { %v858_v14 = vadd.f32 %v854_v7, %v2280_v33  ;;  %v856_v20 = vadd.f32 %v855_v11, %v2201_v17 }
 0xc37   :  { %1818 = vtanh.f32 %v858_v14  ;;  %v1623_v29 = vmul.f32 -1.442695, %v858_v14  ;;  %v1624_v31 = vmul.f32 -1.442695, %v856_v20 }
 0xc38   :  { %1820 = vtanh.f32 %v856_v20 }
 0xc39   :  { %1822 = vpow2.f32 %v1623_v29 }
 0xc3a   :  { %1824 = vpow2.f32 %v1624_v31 }
 0xc44   :  { %v1819_v23 = vpop.eup %1818 }
 0xc45   :  { %v1821_v26 = vpop.eup %1820  ;;  %868 = vrot.lane.b32.xlu1 %v1819_v23, %s1956_s4 }
 0xc46   :  { %892 = vrot.lane.b32.xlu0 %v1821_v26, %s1956_s4  ;;  %v1823_v8 = vpop.eup %1822 }
 0xc47   :  { %v1825_v44 = vpop.eup %1824  ;;  %v862_v36 = vadd.f32 1.0, %v1823_v8 }
 0xc48   :  { %v886_v37 = vadd.f32 1.0, %v1825_v44 }
 0xc49   :  { %1826 = vrcp.f32 %v862_v36 }
 0xc4a   :  { %1828 = vrcp.f32 %v886_v37 }
 0xc56   :  { %v1827_v33 = vpop.eup %1826 }
 0xc57   :  { %v1829_v39 = vpop.eup %1828  ;;  %v866_v45 = vmul.f32 %v1827_v33, %v2335_v58 }
 0xc58   :  { %v890_v42 = vmul.f32 %v1829_v39, %v2337_v59 }
 0xcb7   :  { %v869_v38 = vpop.permute.xlu1 %868 }
 0xcb8   :  { %v893_v40 = vpop.permute.xlu0 %892  ;;  %v871_v41 = vmul.f32 %v1827_v33, %v869_v38  ;;  %v1891_v38 = vld [vmem:[#allocation2 + $0x68] sm:$0xff] }
 0xcb9   :  { %v895_v43 = vmul.f32 %v1829_v39, %v893_v40  ;;  %v1893_v40 = vld [vmem:[#allocation2 + $0x58] sm:$0xff] }
 0xcba   :  { %873 = vrot.lane.b32.xlu1 %v871_v41, %s1956_s4  ;;  %v1894_v41 = vld [vmem:[#allocation2 + $0x50] sm:$0xff] }
 0xcbb   :  { %897 = vrot.lane.b32.xlu0 %v895_v43, %s1956_s4  ;;  %v1895_v43 = vld [vmem:[#allocation2 + $0x48] sm:$0xff] }
 0xd2c   :  { %v874_v46 = vpop.permute.xlu1 %873 }
 0xd2d   :  { %v898_v47 = vpop.permute.xlu0 %897  ;;  %v2376_v48 = vadd.f32 %v874_v46, %v866_v45  ;;  %v1896_v45 = vld [vmem:[#allocation2 + $0x40] sm:$0xff]  ;;  %v1898_v46 = vld [vmem:[#allocation2 + $0x30] sm:$0xff] }
 0xd2e   :  { %v2378_v49 = vadd.f32 %v898_v47, %v890_v42  ;;  %v1897_v42 = vld [vmem:[#allocation2 + $0x38] sm:$0xff]  ;;  %v1899_v47 = vld [vmem:[#allocation2 + $0x28] sm:$0xff] }
 0xd2f   :  { %1830 = vtanh.f32 %v2376_v48 }
 0xd30   :  { %1832 = vtanh.f32 %v2378_v49 }
 0xd3c   :  { %v1831_v50 = vpop.eup %1830 }
 0xd3d   :  { %v1833_v52 = vpop.eup %1832  ;;  %879 = vrot.lane.b32.xlu1 %v1831_v50, %s1956_s4  ;;  %v1903_v50 = vld [vmem:[#allocation2 + $0x8] sm:$0xff] }
 0xd3e   :  { %903 = vrot.lane.b32.xlu0 %v1833_v52, %s1956_s4 }
 0xdaf   :  { %v880_v53 = vpop.permute.xlu1 %879 }
 0xdb0   :  { %v904_v54 = vpop.permute.xlu0 %903  ;;  %v882_v57 = vmul.f32 %v1827_v33, %v880_v53  ;;  %v1890_v33 = vld [vmem:[#allocation2 + $0x70] sm:$0xff] }
 0xdb1   :  { %v2384_v58 = vmul.f32 %v1829_v39, %v904_v54  ;;  %v1892_v39 = vld [vmem:[#allocation2 + $0x60] sm:$0xff] }
 0xdb2   :  { %908 = vrot.lane.b32.xlu1 %v882_v57, %s1958_s3 }
 0xdb3   :  { %912 = vrot.lane.b32.xlu0 %v2384_v58, %s1959_s28 }
 0xe24   :  { %v909_v59 = vpop.permute.xlu1 %908 }
 0xe25   :  { %v913_v60 = vpop.permute.xlu0 %912 }
 0xe26   :  { %v915_v61 = vsel %vm274_vm0, %v909_v59, %v913_v60 }
 0xe27   :  { %1625 = vmatmul.mubr.msk.f32.vlgmr.msra.gmra.mxu1 %vm276_vm1, %v915_v61 }
 0xe28   :  { %1200 = vmatpush1.msra.mxu1 %v2034_v9  ;;  %1247 = vmatprep.mubr.f32.mxu1 %v1955_v1 }
 0xe29   :  { %1201 = vmatprep.subr.mxu1 %v2036_v10 }
 0xe2a   :  { %1202 = vmatpush1.msra.mxu1 %v2041_v12 }
 0xe2b   :  { %1203 = vmatprep.subr.mxu1 %v2044_v13 }
 0xe2c   :  { %1204 = vmatpush1.msra.mxu1 %v2050_v15 }
 0xe2d   :  { %1205 = vmatprep.subr.mxu1 %v2053_v16 }
 0xe2e   :  { %1206 = vmatpush1.msra.mxu1 %v2059_v18 }
 0xe2f   :  { %1207 = vmatprep.subr.mxu1 %v2062_v19 }
 0xe30   :  { %1208 = vmatpush1.msra.mxu1 %v2068_v21 }
 0xe31   :  { %1209 = vmatprep.subr.mxu1 %v2071_v22 }
 0xe32   :  { %1210 = vmatpush1.msra.mxu1 %v2077_v24 }
 0xe33   :  { %1211 = vmatprep.subr.mxu1 %v2080_v25 }
 0xe34   :  { %1212 = vmatpush1.msra.mxu1 %v2086_v27 }
 0xe35   :  { %1213 = vmatprep.subr.mxu1 %v2089_v28 }
 0xe36   :  { %1214 = vmatpush1.msra.mxu1 %v2095_v30 }
 0xee7   :  { %v985_v9 = vpop.f32.mrf.mxu1 }
 0xee8   :  { %v986_v10 = vadd.f32 %v985_v9, %v2174_v51 }
 0xee9   :  { %v987_v12 = vpop.f32.mrf.mxu1 }
 0xeea   :  { %v990_v13 = vadd.f32 %v2278_v32, %v986_v10  ;;  %v988_v15 = vadd.f32 %v987_v12, %v2201_v17 }
 0xeec   :  { %1834 = vtanh.f32 %v990_v13  ;;  %v1626_v19 = vmul.f32 -1.442695, %v990_v13  ;;  %v1627_v21 = vmul.f32 -1.442695, %v988_v15 }
 0xeed   :  { %1836 = vtanh.f32 %v988_v15 }
 0xeee   :  { %1838 = vpow2.f32 %v1626_v19 }
 0xeef   :  { %1840 = vpow2.f32 %v1627_v21 }
 0xef9   :  { %v1835_v16 = vpop.eup %1834 }
 0xefa   :  { %v1837_v18 = vpop.eup %1836  ;;  %1000 = vrot.lane.b32.xlu1 %v1835_v16, %s1956_s4 }
 0xefb   :  { %1024 = vrot.lane.b32.xlu0 %v1837_v18, %s1956_s4  ;;  %v1839_v22 = vpop.eup %1838 }
 0xefc   :  { %v1841_v24 = vpop.eup %1840  ;;  %v994_v25 = vadd.f32 1.0, %v1839_v22 }
 0xefd   :  { %v1018_v27 = vadd.f32 1.0, %v1841_v24 }
 0xefe   :  { %1842 = vrcp.f32 %v994_v25 }
 0xeff   :  { %1844 = vrcp.f32 %v1018_v27 }
 0xf0b   :  { %v1843_v28 = vpop.eup %1842 }
 0xf0c   :  { %v1845_v62 = vpop.eup %1844  ;;  %v998_v4 = vmul.f32 %v1843_v28, %v2376_v48  ;;  %v1900_v48 = vld [vmem:[#allocation2 + $0x20] sm:$0xff] }
 0xf0d   :  { %v1022_v6 = vmul.f32 %v1845_v62, %v2378_v49  ;;  %v1902_v49 = vld [vmem:[#allocation2 + $0x10] sm:$0xff] }
 0xf6c   :  { %v1001_v32 = vpop.permute.xlu1 %1000 }
 0xf6d   :  { %v1025_v63 = vpop.permute.xlu0 %1024  ;;  %v1003_v0 = vmul.f32 %v1843_v28, %v1001_v32 }
 0xf6e   :  { %v1027_v3 = vmul.f32 %v1845_v62, %v1025_v63 }
 0xf6f   :  { %1005 = vrot.lane.b32.xlu1 %v1003_v0, %s1956_s4 }
 0xf70   :  { %1029 = vrot.lane.b32.xlu0 %v1027_v3, %s1956_s4 }
 0xfe1   :  { %v1006_v55 = vpop.permute.xlu1 %1005 }
 0xfe2   :  { %v1030_v7 = vpop.permute.xlu0 %1029  ;;  %v2416_v11 = vadd.f32 %v1006_v55, %v998_v4 }
 0xfe3   :  { %v2418_v14 = vadd.f32 %v1030_v7, %v1022_v6 }
 0xfe4   :  { %1846 = vtanh.f32 %v2416_v11 }
 0xfe5   :  { %1848 = vtanh.f32 %v2418_v14 }
 0xff1   :  { %v1847_v20 = vpop.eup %1846 }
 0xff2   :  { %v1849_v23 = vpop.eup %1848  ;;  %1011 = vrot.lane.b32.xlu1 %v1847_v20, %s1956_s4 }
 0xff3   :  { %1035 = vrot.lane.b32.xlu0 %v1849_v23, %s1956_s4 }
0x1064   :  { %v1012_v26 = vpop.permute.xlu1 %1011 }
0x1065   :  { %v1036_v29 = vpop.permute.xlu0 %1035  ;;  %v1014_v31 = vmul.f32 %v1843_v28, %v1012_v26 }
0x1066   :  { %v2424_v8 = vmul.f32 %v1845_v62, %v1036_v29 }
0x1067   :  { %1040 = vrot.lane.b32.xlu1 %v1014_v31, %s1958_s3 }
0x1068   :  { %1044 = vrot.lane.b32.xlu0 %v2424_v8, %s1959_s28 }
0x10d9   :  { %v1041_v44 = vpop.permute.xlu1 %1040 }
0x10da   :  { %v1045_v36 = vpop.permute.xlu0 %1044 }
0x10db   :  { %v1047_v37 = vsel %vm274_vm0, %v1041_v44, %v1045_v36 }
0x10dc   :  { %1628 = vmatmul.mubr.msk.f32.vlgmr.msra.gmra.mxu0 %vm276_vm1, %v1047_v37 }
0x10dd   :  { %1332 = vmatpush1.msra.mxu0 %v1890_v33  ;;  %1379 = vmatprep.mubr.f32.mxu0 %v1955_v1  ;;  %v1901_v1 = vld [vmem:[#allocation2 + $0x18] sm:$0xff] }
0x10de   :  { %1333 = vmatprep.subr.mxu0 %v1891_v38 }
0x10df   :  { %1334 = vmatpush1.msra.mxu0 %v1892_v39 }
0x10e0   :  { %1335 = vmatprep.subr.mxu0 %v1893_v40 }
0x10e1   :  { %1336 = vmatpush1.msra.mxu0 %v1894_v41 }
0x10e2   :  { %1337 = vmatprep.subr.mxu0 %v1895_v43 }
0x10e3   :  { %1338 = vmatpush1.msra.mxu0 %v1896_v45 }
0x10e4   :  { %1339 = vmatprep.subr.mxu0 %v1897_v42 }
0x10e5   :  { %1340 = vmatpush1.msra.mxu0 %v1898_v46 }
0x10e6   :  { %1341 = vmatprep.subr.mxu0 %v1899_v47 }
0x10e7   :  { %1342 = vmatpush1.msra.mxu0 %v1900_v48 }
0x10e8   :  { %1343 = vmatprep.subr.mxu0 %v1901_v1 }
0x10e9   :  { %1344 = vmatpush1.msra.mxu0 %v1902_v49 }
0x10ea   :  { %1345 = vmatprep.subr.mxu0 %v1903_v50 }
0x10eb   :  { %1346 = vmatpush1.msra.mxu0 %v2095_v30 }
0x119c   :  { %v1117_v52 = vpop.f32.mrf.mxu0 }
0x119d   :  { %v1118_v53 = vadd.f32 %v1117_v52, %v2174_v51 }
0x119e   :  { %v1119_v54 = vpop.f32.mrf.mxu0 }
0x119f   :  { %v1122_v57 = vadd.f32 %v1118_v53, %v2284_v35  ;;  %v1120_v59 = vadd.f32 %v1119_v54, %v2201_v17 }
0x11a1   :  { %1850 = vtanh.f32 %v1122_v57  ;;  %v1629_v9 = vmul.f32 -1.442695, %v1122_v57  ;;  %v1630_v10 = vmul.f32 -1.442695, %v1120_v59 }
0x11a2   :  { %1852 = vtanh.f32 %v1120_v59 }
0x11a3   :  { %1854 = vpow2.f32 %v1629_v9 }
0x11a4   :  { %1856 = vpow2.f32 %v1630_v10 }
0x11ae   :  { %v1851_v60 = vpop.eup %1850 }
0x11af   :  { %v1853_v61 = vpop.eup %1852  ;;  %1132 = vrot.lane.b32.xlu1 %v1851_v60, %s1956_s4 }
0x11b0   :  { %1156 = vrot.lane.b32.xlu0 %v1853_v61, %s1956_s4  ;;  %v1855_v30 = vpop.eup %1854 }
0x11b1   :  { %v1857_v12 = vpop.eup %1856  ;;  %v1126_v13 = vadd.f32 1.0, %v1855_v30 }
0x11b2   :  { %v1150_v15 = vadd.f32 1.0, %v1857_v12 }
0x11b3   :  { %1858 = vrcp.f32 %v1126_v13 }
0x11b4   :  { %1860 = vrcp.f32 %v1150_v15 }
0x11c0   :  { %v1859_v35 = vpop.eup %1858 }
0x11c1   :  { %v1861_v18 = vpop.eup %1860  ;;  %v1130_v24 = vmul.f32 %v1859_v35, %v2416_v11 }
0x11c2   :  { %v1154_v25 = vmul.f32 %v1861_v18, %v2418_v14 }
0x1221   :  { %v1133_v16 = vpop.permute.xlu1 %1132 }
0x1222   :  { %v1157_v19 = vpop.permute.xlu0 %1156  ;;  %v1135_v21 = vmul.f32 %v1859_v35, %v1133_v16 }
0x1223   :  { %v1159_v22 = vmul.f32 %v1861_v18, %v1157_v19 }
0x1224   :  { %1137 = vrot.lane.b32.xlu1 %v1135_v21, %s1956_s4 }
0x1225   :  { %1161 = vrot.lane.b32.xlu0 %v1159_v22, %s1956_s4 }
0x1296   :  { %v1138_v27 = vpop.permute.xlu1 %1137 }
0x1297   :  { %v1162_v28 = vpop.permute.xlu0 %1161  ;;  %v1140_v32 = vadd.f32 %v1138_v27, %v1130_v24 }
0x1298   :  { %v1164_v62 = vadd.f32 %v1162_v28, %v1154_v25  ;;  %v1411_v25 = vld [vmem:[#allocation4 + $0x10] sm:$0xff] }
0x1299   :  { %1862 = vtanh.f32 %v1140_v32 }
0x129a   :  { %1864 = vtanh.f32 %v1164_v62 }
0x12a6   :  { %v1863_v63 = vpop.eup %1862 }
0x12a7   :  { %v1865_v0 = vpop.eup %1864  ;;  %1143 = vrot.lane.b32.xlu1 %v1863_v63, %s1956_s4 }
0x12a8   :  { %1167 = vrot.lane.b32.xlu0 %v1865_v0, %s1956_s4 }
0x1319   :  { %v1144_v3 = vpop.permute.xlu1 %1143 }
0x131a   :  { %v1168_v4 = vpop.permute.xlu0 %1167  ;;  %v1146_v6 = vmul.f32 %v1859_v35, %v1144_v3 }
0x131b   :  { %v2444_v55 = vmul.f32 %v1861_v18, %v1168_v4 }
0x131c   :  { %1172 = vrot.lane.b32.xlu1 %v1146_v6, %s1958_s3 }
0x131d   :  { %1176 = vrot.lane.b32.xlu0 %v2444_v55, %s1959_s28 }
0x138e   :  { %v1173_v7 = vpop.permute.xlu1 %1172 }
0x138f   :  { %v1177_v11 = vpop.permute.xlu0 %1176 }
0x1390   :  { %v1179_v14 = vsel %vm274_vm0, %v1173_v7, %v1177_v11 }
0x1391   :  { %1631 = vmatmul.mubr.msk.f32.vlgmr.msra.gmra.mxu1 %vm276_vm1, %v1179_v14 }
0x1451   :  { %v1249_v20 = vpop.f32.mrf.mxu1 }
0x1452   :  { %v1250_v23 = vadd.f32 %v1249_v20, %v2174_v51  ;;  %v1636_v20 = vld [vmem:[%s2540_s5] ss:$0 sm:$0xff] }
0x1453   :  { %v1251_v26 = vpop.f32.mrf.mxu1 }
0x1454   :  { %v1254_v29 = vadd.f32 %v2282_v34, %v1250_v23  ;;  %v1252_v31 = vadd.f32 %v1251_v26, %v2201_v17 }
0x1456   :  { %1866 = vtanh.f32 %v1254_v29  ;;  %v1632_v37 = vmul.f32 -1.442695, %v1254_v29  ;;  %v1633_v33 = vmul.f32 -1.442695, %v1252_v31 }
0x1457   :  { %1868 = vtanh.f32 %v1252_v31 }
0x1458   :  { %1870 = vpow2.f32 %v1632_v37 }
0x1459   :  { %1872 = vpow2.f32 %v1633_v33 }
0x1463   :  { %v1867_v44 = vpop.eup %1866 }
0x1464   :  { %v1869_v36 = vpop.eup %1868  ;;  %1264 = vrot.lane.b32.xlu1 %v1867_v44, %s1956_s4 }
0x1465   :  { %1288 = vrot.lane.b32.xlu0 %v1869_v36, %s1956_s4  ;;  %v1871_v38 = vpop.eup %1870 }
0x1466   :  { %v1873_v39 = vpop.eup %1872  ;;  %v1258_v51 = vadd.f32 1.0, %v1871_v38 }
0x1467   :  { %v1282_v40 = vadd.f32 1.0, %v1873_v39 }
0x1468   :  { %1874 = vrcp.f32 %v1258_v51 }
0x1469   :  { %1876 = vrcp.f32 %v1282_v40 }
0x1475   :  { %v1875_v34 = vpop.eup %1874 }
0x1476   :  { %v1877_v43 = vpop.eup %1876  ;;  %v1262_v47 = vmul.f32 %v1875_v34, %v1140_v32 }
0x1477   :  { %v1286_v48 = vmul.f32 %v1877_v43, %v1164_v62 }
0x14d6   :  { %v1265_v41 = vpop.permute.xlu1 %1264 }
0x14d7   :  { %v1289_v45 = vpop.permute.xlu0 %1288  ;;  %v1267_v42 = vmul.f32 %v1875_v34, %v1265_v41 }
0x14d8   :  { %v1291_v46 = vmul.f32 %v1877_v43, %v1289_v45 }
0x14d9   :  { %1269 = vrot.lane.b32.xlu1 %v1267_v42, %s1956_s4 }
0x14da   :  { %1293 = vrot.lane.b32.xlu0 %v1291_v46, %s1956_s4 }
0x154b   :  { %v1270_v1 = vpop.permute.xlu1 %1269 }
0x154c   :  { %v1294_v49 = vpop.permute.xlu0 %1293  ;;  %v1272_v50 = vadd.f32 %v1270_v1, %v1262_v47 }
0x154d   :  { %v1296_v52 = vadd.f32 %v1294_v49, %v1286_v48 }
0x154e   :  { %1878 = vtanh.f32 %v1272_v50 }
0x154f   :  { %1880 = vtanh.f32 %v1296_v52 }
0x155b   :  { %v1879_v53 = vpop.eup %1878 }
0x155c   :  { %v1881_v54 = vpop.eup %1880  ;;  %1275 = vrot.lane.b32.xlu1 %v1879_v53, %s1956_s4 }
0x155d   :  { %1299 = vrot.lane.b32.xlu0 %v1881_v54, %s1956_s4 }
0x15ce   :  { %v1276_v57 = vpop.permute.xlu1 %1275 }
0x15cf   :  { %v1300_v59 = vpop.permute.xlu0 %1299  ;;  %v1278_v60 = vmul.f32 %v1875_v34, %v1276_v57 }
0x15d0   :  { %v1302_v61 = vmul.f32 %v1877_v43, %v1300_v59 }
0x15d1   :  { %1304 = vrot.lane.b32.xlu1 %v1278_v60, %s1958_s3 }
0x15d2   :  { %1308 = vrot.lane.b32.xlu0 %v1302_v61, %s1959_s28 }
0x1643   :  { %v1305_v9 = vpop.permute.xlu1 %1304 }
0x1644   :  { %v1309_v10 = vpop.permute.xlu0 %1308  ;;  %1566 = vst.msk [vmem:[%s2543_s8] sm:$0xff] %vm274_vm0, %v1305_v9 }
0x1645   :  { %v1311_v30 = vsel %vm274_vm0, %v1305_v9, %v1309_v10 }
0x1646   :  { %1634 = vmatmul.mubr.msk.f32.vlgmr.msra.gmra.mxu0 %vm276_vm1, %v1311_v30 }
0x1706   :  { %v1381_v12 = vpop.f32.mrf.mxu0 }
0x1708   :  { %v1382_v13 = vpop.f32.mrf.mxu0 }
0x1709   :  { %v1383_v15 = vadd.f32 %v1382_v13, %v2201_v17  ;;  %v1412_v17 = vld [vmem:[#allocation4 + $0x18] sm:$0xff] }
0x170a   :  { %1728 = vmatprep.subr.mxu1 %v1412_v17 }
0x170b   :  { %1882 = vtanh.f32 %v1383_v15  ;;  %v1635_v16 = vmul.f32 -1.442695, %v1383_v15  ;;  %1729 = vmatpush3.msra.mxu1 %v1412_v17 }
0x170c   :  { %1730 = vmatprep.subr.mxu1 %v1411_v25 }
0x170d   :  { %1884 = vpow2.f32 %v1635_v16  ;;  %1731 = vmatpush3.msra.mxu1 %v1411_v25 }
0x1718   :  { %v1883_v35 = vpop.eup %1882 }
0x1719   :  { %1394 = vrot.lane.b32.xlu1 %v1883_v35, %s1956_s4 }
0x171a   :  { %v1885_v18 = vpop.eup %1884 }
0x171b   :  { %v1388_v19 = vadd.f32 1.0, %v1885_v18 }
0x171d   :  { %1886 = vrcp.f32 %v1388_v19 }
0x172a   :  { %v1887_v21 = vpop.eup %1886 }
0x172b   :  { %v1392_v27 = vmul.f32 %v1887_v21, %v1296_v52 }
0x178b   :  { %v1395_v22 = vpop.permute.xlu1 %1394 }
0x178c   :  { %v1397_v24 = vmul.f32 %v1887_v21, %v1395_v22 }
0x178e   :  { %1399 = vrot.lane.b32.xlu0 %v1397_v24, %s1956_s4 }
0x1792   :  { %1421 = vrot.lane.b32.xlu0 %v2239_v5, %s1958_s3  ;;  %v1410_v5 = vld [vmem:[#allocation4 + $0x8] sm:$0xff] }
0x1793   :  { %1732 = vmatprep.subr.mxu1 %v1410_v5 }
0x1794   :  { %1733 = vmatpush3.msra.mxu1 %v1410_v5 }
0x1796   :  { %1425 = vrot.lane.b32.xlu0 %v2343_v2, %s1958_s3  ;;  %v1409_v2 = vld [vmem:[#allocation4] sm:$0xff] }
0x1797   :  { %1734 = vmatprep.subr.mxu1 %v1409_v2 }
0x1798   :  { %1735 = vmatpush3.msra.mxu1 %v1409_v2 }
0x179a   :  { %1429 = vrot.lane.b32.xlu0 %v2424_v8, %s1958_s3 }
0x179e   :  { %1433 = vrot.lane.b32.xlu0 %v1302_v61, %s1958_s3 }
0x17a2   :  { %1568 = vrot.lane.b32.xlu0 %v1272_v50, %s1959_s28 }
0x1800   :  { %v1400_v28 = vpop.permute.xlu0 %1399 }
0x1801   :  { %v1402_v32 = vadd.f32 %v1400_v28, %v1392_v27 }
0x1803   :  { %1888 = vtanh.f32 %v1402_v32 }
0x1804   :  { %v1422_v62 = vpop.permute.xlu0 %1421 }
0x1805   :  { %1736 = vmatprep.mubr.msk.f32.mxu1 %vm274_vm0, %v1422_v62 }
0x1808   :  { %v1426_v8 = vpop.permute.xlu0 %1425 }
0x180c   :  { %v1430_v63 = vpop.permute.xlu0 %1429 }
0x1810   :  { %v1889_v0 = vpop.eup %1888  ;;  %v1434_v3 = vpop.permute.xlu0 %1433 }
0x1811   :  { %1405 = vrot.lane.b32.xlu1 %v1889_v0, %s1956_s4 }
0x1814   :  { %v1569_v4 = vpop.permute.xlu0 %1568 }
0x1815   :  { %1645 = vst.msk [vmem:[%s2543_s8 + $0x10] sm:$0xff] %vm274_vm0, %v1569_v4  ;;  %1423 = vrot.lane.b32.xlu1 %v2302_v56, %s1958_s3 }
0x1819   :  { %1427 = vrot.lane.b32.xlu1 %v2384_v58, %s1958_s3 }
0x181d   :  { %1431 = vrot.lane.b32.xlu1 %v2444_v55, %s1958_s3 }
0x1883   :  { %v1406_v6 = vpop.permute.xlu1 %1405 }
0x1884   :  { %v1408_v7 = vmul.f32 %v1887_v21, %v1406_v6 }
0x1886   :  { %1435 = vrot.lane.b32.xlu1 %v1408_v7, %s1958_s3 }
0x1887   :  { %v1424_v11 = vpop.permute.xlu1 %1423 }
0x1888   :  { %1737 = vmatmul.mubr.msk.f32.vlgmr.msra.gmra.mxu1 %vm274_vm0, %v1424_v11 }
0x1889   :  { %1739 = vmatprep.mubr.msk.f32.mxu1 %vm274_vm0, %v1426_v8 }
0x188a   :  { %1577 = vrot.lane.b32.xlu1 %v1402_v32, %s1959_s28 }
0x188b   :  { %v1428_v14 = vpop.permute.xlu1 %1427 }
0x188c   :  { %1740 = vmatmul.mubr.msk.f32.gmra.mxu1 %vm274_vm0, %v1428_v14 }
0x188d   :  { %1742 = vmatprep.mubr.msk.f32.mxu1 %vm274_vm0, %v1430_v63 }
0x188f   :  { %v1432_v56 = vpop.permute.xlu1 %1431 }
0x1890   :  { %1743 = vmatmul.mubr.msk.f32.gmra.mxu1 %vm274_vm0, %v1432_v56 }
0x1891   :  { %1745 = vmatprep.mubr.msk.f32.mxu1 %vm274_vm0, %v1434_v3 }
0x18f8   :  { %v1436_v58 = vpop.permute.xlu1 %1435 }
0x18f9   :  { %1646 = vst.msk [vmem:[%s2543_s8 + $0x8] sm:$0xff] %vm274_vm0, %v1436_v58  ;;  %1746 = vmatmul.mubr.msk.f32.gmra.mxu1 %vm274_vm0, %v1436_v58 }
0x18fc   :  { %v1578_v55 = vpop.permute.xlu1 %1577 }
0x18fd   :  { %1647 = vst.msk [vmem:[%s2543_s8 + $0x18] sm:$0xff] %vm274_vm0, %v1578_v55 }
0x1948   :  { %v1738_v23 = vpop.f32.mrf.mxu1 }
0x1949   :  { %v1525_v26 = vadd.f32 %v1738_v23, %v1636_v20 }
0x194a   :  { %v1519_v29 = vpop.f32.mrf.mxu1 }
0x194b   :  { %1559 = vst [vmem:[%s2542_s7 + $0x8] sm:$0xff] %v1525_v26  ;;  %v1520_v31 = vadd.f32 %v1636_v20, %v1519_v29 }
0x194c   :  { %v1741_v44 = vpop.f32.mrf.mxu1 }
0x194d   :  { %1558 = vst [vmem:[%s2542_s7] sm:$0xff] %v1520_v31  ;;  %v1535_v36 = vadd.f32 %v1741_v44, %v1636_v20 }
0x194e   :  { %v1529_v37 = vpop.f32.mrf.mxu1 }
0x194f   :  { %1561 = vst [vmem:[%s2542_s7 + $0x18] sm:$0xff] %v1535_v36  ;;  %v1530_v33 = vadd.f32 %v1636_v20, %v1529_v37 }
0x1950   :  { %v1744_v38 = vpop.f32.mrf.mxu1 }
0x1951   :  { %1560 = vst [vmem:[%s2542_s7 + $0x10] sm:$0xff] %v1530_v33  ;;  %v1545_v39 = vadd.f32 %v1744_v38, %v1636_v20 }
0x1952   :  { %v1539_v51 = vpop.f32.mrf.mxu1 }
0x1953   :  { %1563 = vst [vmem:[%s2542_s7 + $0x28] sm:$0xff] %v1545_v39  ;;  %v1540_v40 = vadd.f32 %v1636_v20, %v1539_v51 }
0x1955   :  { %1562 = vst [vmem:[%s2542_s7 + $0x20] sm:$0xff] %v1540_v40 }
0x19b9   :  { %v1747_v34 = vpop.f32.mrf.mxu1 }
0x19ba   :  { %v1555_v41 = vadd.f32 %v1747_v34, %v1636_v20 }
0x19bb   :  { %v1549_v43 = vpop.f32.mrf.mxu1 }
0x19bc   :  { %1565 = vst [vmem:[%s2542_s7 + $0x38] sm:$0xff] %v1555_v41  ;;  %v1550_v45 = vadd.f32 %v1636_v20, %v1549_v43 }
0x19be   :  { %1564 = vst [vmem:[%s2542_s7 + $0x30] sm:$0xff] %v1550_v45 }
0x19bf   :  { %1590 = vsyncpa [#allocation3], 1 }
0x19c0   :  { %1591 = vsyncpa [#allocation5], 1 }

</bundles_post_ra>
